<compile_context>
chip_gen: v7x
topology: tpu7x:2x2x1
jax: 0.10.0
libtpu: 0.0.40
codegen_flags: <defaults>
</compile_context>

<pallas_src>
import numpy as np
import jax
import jax.numpy as jnp
from jax.experimental import pallas as pl
from jax.experimental.pallas import tpu as pltpu

# ---------------------------------------------------------------------------
# Static PDE / fluid configuration (mirrors Black_oil.__init__ arguments).
# ---------------------------------------------------------------------------
CFG = dict(
    UIR=5000.0, pini_alt=600.0,
    LUB=1e-1, HUB=1.0, aay=50.0, bby=500.0,
    SWI=0.1, SWR=0.1, UW=1.0, BW=1.0, UO=2.5, BO=1.1,
    MAXZ=6000.0,
    approach=1,
)


# ---------------------------------------------------------------------------
# Pallas kernel
# ---------------------------------------------------------------------------
def _make_black_oil_kernel(cfg, T, NX, NY):
    UIR = float(cfg["UIR"])
    pini_alt = float(cfg["pini_alt"])
    SWI = float(cfg["SWI"])
    SWR = float(cfg["SWR"])
    UW = float(cfg["UW"])
    BW = float(cfg["BW"])
    UO = float(cfg["UO"])
    BO = float(cfg["BO"])
    MAXZ = float(cfg["MAXZ"])
    m_lin = (cfg["bby"] - cfg["aay"]) / (cfg["HUB"] - cfg["LUB"])
    b_lin = cfg["aay"] - m_lin * cfg["LUB"]

    NXNY = NX * NY
    inv_dxf = float(NY)                      # dxf = 1.0 / u.shape[3]
    scale = (1.0 / NY) * 1.0e-7              # dxf * 1e-7, folded everywhere
    inv_swr = 1.0 / (1.0 - SWI - SWR)
    inv_uwbw = 1.0 / (UW * BW)
    inv_uobo = 1.0 / (UO * BO)

    # folded finite-difference coefficients
    d1c = 0.5 * pini_alt * inv_dxf           # (u[i+1]-u[i-1]) -> du/dx (u unscaled)
    d2c_s = pini_alt * inv_dxf * inv_dxf * scale      # Laplacian coeff, pre-scaled
    dperm_sc = 0.5 * m_lin * inv_dxf * scale          # perm diff -> d(a)/dx, pre-scaled
    fin_c = UIR * scale
    poro_c = scale / MAXZ

    def kernel(siniuse_ref, u_ref, sat_ref, aux_ref, p_out_ref, s_out_ref):
        siniuse = siniuse_ref[0, 0]

        # ---- replicate-boundary stencil machinery (lane axis = NX*NY) ----
        lane = jax.lax.broadcasted_iota(jnp.int32, (1, NXNY), 1)
        j = lane % NY
        mask_j0 = j == 0                      # y == 0        -> jm tap = center
        mask_jL = j == NY - 1                 # y == NY-1     -> jp tap = center
        mask_i0 = lane < NY                   # x == 0        -> im tap = center
        mask_iL = lane >= NXNY - NY           # x == NX-1     -> ip tap = center

        def edge_taps(x):
            """Replicate-padded +-1 neighbours of x (rows, NX*NY)."""
            x_jm = jnp.where(mask_j0, x, pltpu.roll(x, 1, axis=1))
            x_jp = jnp.where(mask_jL, x, pltpu.roll(x, NXNY - 1, axis=1))
            x_im = jnp.where(mask_i0, x, pltpu.roll(x, NY, axis=1))
            x_ip = jnp.where(mask_iL, x, pltpu.roll(x, NXNY - NY, axis=1))
            return x_ip, x_im, x_jp, x_jm

        # ---- per-batch (t-invariant) maps, one coalesced aux DMA ----------
        perm = aux_ref[pl.ds(0, 1), :]        # (1, NXNY)
        fin = aux_ref[pl.ds(1, 1), :]
        finw = aux_ref[pl.ds(2, 1), :]
        dt = aux_ref[pl.ds(3, 1), :]
        poro = aux_ref[pl.ds(4, 1), :]

        a = m_lin * perm + b_lin              # perm rescaled to [aay, bby]

        p_ip, p_im, p_jp, p_jm = edge_taps(perm)

        # channel-0 mobilities (prior_sat[:, 0] == siniuse -> scalar); these
        # drive dcdx/dcdy/dadx/dady in the reference (dx of a1 channel 0).
        S0 = (siniuse - SWI) * inv_swr
        Mw0 = (S0 * S0) * inv_uwbw
        Mo0 = ((1.0 - S0) * (1.0 - S0)) * inv_uobo
        Mt0 = Mw0 + Mo0

        dcdx_s = (Mt0 * dperm_sc) * (p_ip - p_im)     # scale folded in
        dcdy_s = (Mt0 * dperm_sc) * (p_jp - p_jm)
        dadx_s = (Mw0 * dperm_sc) * (p_ip - p_im)
        dady_s = (Mw0 * dperm_sc) * (p_jp - p_jm)

        fin_s = fin * fin_c                   # UIR * scale folded
        finw_s = finw * fin_c
        pd = (poro * poro_c) / dt             # poro * scale / (dt * MAXZ), hoisted

        def stencil(u):
            """du/dx, du/dy, scaled 5-pt Laplacian for pressure rows u."""
            u_ip, u_im, u_jp, u_jm = edge_taps(u)
            dudx = (u_ip - u_im) * d1c
            dudy = (u_jp - u_jm) * d1c
            lap_s = (u_ip + u_im + u_jp + u_jm - 4.0 * u) * d2c_s
            return dudx, dudy, lap_s

        def residuals(dudx, dudy, lap_s, a1, a1w, dsw):
            p = fin_s + dcdx_s * dudx + dcdy_s * dudy + a1 * lap_s
            s = pd * dsw - (dadx_s * dudx + dady_s * dudy + a1w * lap_s + finw_s)
            return p, s

        # ---- t == 0 row: prior saturation is the scalar siniuse -----------
        u0 = u_ref[pl.ds(0, 1), :]
        sat0 = sat_ref[pl.ds(0, 1), :]
        dudx0, dudy0, lap0 = stencil(u0)
        dsw0 = jnp.maximum(sat0 - siniuse, 0.001)
        p0, s0 = residuals(dudx0, dudy0, lap0, Mt0 * a, Mw0 * a, dsw0)
        p_out_ref[pl.ds(0, 1), :] = p0
        s_out_ref[pl.ds(0, 1), :] = s0

        # ---- t >= 1 rows: prior saturation is sat[t-1] (ref slice, no copy)
        if T > 1:
            ur = u_ref[pl.ds(1, T - 1), :]
            prior = sat_ref[pl.ds(0, T - 1), :]
            satr = sat_ref[pl.ds(1, T - 1), :]
            dudx, dudy, lap_s = stencil(ur)
            S = (prior - SWI) * inv_swr
            Mw = (S * S) * inv_uwbw
            Mo = ((1.0 - S) * (1.0 - S)) * inv_uobo
            a1 = (Mw + Mo) * a
            a1w = Mw * a
            dsw = jnp.maximum(satr - prior, 0.001)
            pr, sr = residuals(dudx, dudy, lap_s, a1, a1w, dsw)
            p_out_ref[pl.ds(1, T - 1), :] = pr
            s_out_ref[pl.ds(1, T - 1), :] = sr

    return kernel


# ---------------------------------------------------------------------------
# Wrapper: only free (contiguous) reshapes + a tiny stack of per-batch maps.
# ---------------------------------------------------------------------------
def black_oil_pallas(input_var, cfg=CFG):
    u = input_var["pressure"].astype(jnp.float32)
    perm = input_var["perm"].astype(jnp.float32)
    fin = input_var["Q"].astype(jnp.float32)
    finw = input_var["Qw"].astype(jnp.float32)
    dt = input_var["Time"].astype(jnp.float32)
    poro = input_var["Phi"].astype(jnp.float32)
    sini = input_var["Swini"].astype(jnp.float32)
    sat = input_var["water_sat"].astype(jnp.float32)

    B, T, NX, NY = u.shape
    NXNY = NX * NY

    # lane-dense views (contiguous reshape, no HBM copy)
    u2 = u.reshape(B, T, NXNY)
    sat2 = sat.reshape(B, T, NXNY)
    # coalesce the five small per-batch maps into one (B, 5, NX*NY) slab
    aux = jnp.stack([perm.reshape(B, NXNY), fin.reshape(B, NXNY),
                     finw.reshape(B, NXNY), dt.reshape(B, NXNY),
                     poro.reshape(B, NXNY)], axis=1)
    siniuse = sini[0, 0, 0, 0].reshape(1, 1)           # siniuse = sini[0,0,0,0]

    b_map = lambda b: (b, 0, 0)
    spec_u = pl.BlockSpec((None, T, NXNY), b_map)      # kernel sees (T, NXNY)
    spec_aux = pl.BlockSpec((None, 5, NXNY), b_map)    # kernel sees (5, NXNY)
    spec_smem = pl.BlockSpec(memory_space=pltpu.MemorySpace.SMEM)

    kernel = _make_black_oil_kernel(cfg, T, NX, NY)
    out_sds = jax.ShapeDtypeStruct((B, T, NXNY), jnp.float32)

    p_loss, s_loss = pl.pallas_call(
        kernel,
        out_shape=(out_sds, out_sds),
        grid_spec=pltpu.PrefetchScalarGridSpec(
            num_scalar_prefetch=0,
            grid=(B,),
            in_specs=[spec_smem, spec_u, spec_u, spec_aux],
            out_specs=[spec_u, spec_u],
        ),
        compiler_params=pltpu.CompilerParams(
            dimension_semantics=("parallel",),
            vmem_limit_bytes=32 * 1024 * 1024),
    )(siniuse, u2, sat2, aux)

    return {"pressured": p_loss.reshape(B, T, NX, NY),
            "saturationd": s_loss.reshape(B, T, NX, NY)}


# ---------------------------------------------------------------------------
# Pure-JAX reference (mirrors the PyTorch approach == 1 branch) for validation
# ---------------------------------------------------------------------------
def black_oil_reference(input_var, cfg=CFG):
    u = input_var["pressure"].astype(jnp.float32) * cfg["pini_alt"]
    perm = input_var["perm"].astype(jnp.float32)
    fin = input_var["Q"].astype(jnp.float32) * cfg["UIR"]
    finw = input_var["Qw"].astype(jnp.float32) * cfg["UIR"]
    dt = input_var["Time"].astype(jnp.float32)
    poro = input_var["Phi"].astype(jnp.float32)
    sini = input_var["Swini"].astype(jnp.float32)
    sat = input_var["water_sat"].astype(jnp.float32)

    B, T, NX, NY = u.shape
    dxf = 1.0 / NY
    siniuse = sini[0, 0, 0, 0]
    m_lin = (cfg["bby"] - cfg["aay"]) / (cfg["HUB"] - cfg["LUB"])
    b_lin = cfg["aay"] - m_lin * cfg["LUB"]
    a = m_lin * perm + b_lin

    prior_sat = jnp.concatenate(
        [jnp.full((B, 1, NX, NY), siniuse, jnp.float32), sat[:, :-1]], axis=1)
    dsw = jnp.maximum(sat - prior_sat, 0.001)
    S = (prior_sat - cfg["SWI"]) / (1.0 - cfg["SWI"] - cfg["SWR"])
    Mw = (S ** 2) / (cfg["UW"] * cfg["BW"])
    Mo = ((1.0 - S) ** 2) / (cfg["UO"] * cfg["BO"])
    Mt = Mw + Mo
    a1 = Mt * a
    a1w = Mw * a

    def pad(x):
        return jnp.pad(x, ((0, 0), (0, 0), (1, 1), (1, 1)), mode="edge")

    def d1(xp, axis):
        if axis == 2:
            ip, im = xp[:, :, 2:, 1:-1], xp[:, :, :-2, 1:-1]
        else:
            ip, im = xp[:, :, 1:-1, 2:], xp[:, :, 1:-1, :-2]
        return (ip - im) * 0.5 / dxf

    def d2(xp, axis):
        c = xp[:, :, 1:-1, 1:-1]
        if axis == 2:
            ip, im = xp[:, :, 2:, 1:-1], xp[:, :, :-2, 1:-1]
        else:
            ip, im = xp[:, :, 1:-1, 2:], xp[:, :, 1:-1, :-2]
        return (ip - 2.0 * c + im) / (dxf * dxf)

    up = pad(u)
    dudx, dudy = d1(up, 2), d1(up, 3)
    dduddx, dduddy = d2(up, 2), d2(up, 3)
    dcdx, dcdy = d1(pad(a1[:, :1]), 2), d1(pad(a1[:, :1]), 3)
    dadx, dady = d1(pad(a1w[:, :1]), 2), d1(pad(a1w[:, :1]), 3)

    p_loss = dxf * 1.0e-7 * (fin + dcdx * dudx + a1 * dduddx
                             + dcdy * dudy + a1 * dduddy)
    flux = dadx * dudx + a1w * dduddx + dady * dudy + a1w * dduddy
    fifth = poro * (dsw / (dt * cfg["MAXZ"]))
    s_loss = dxf * 1.0e-7 * (fifth - (flux + finw))
    return p_loss, s_loss


# ---------------------------------------------------------------------------
if __name__ == "__main__":
    key = jax.random.PRNGKey(0)
    B, T, NX, NY = 2, 4, 32, 32
    ks = jax.random.split(key, 7)
    input_var = {
        "pressure": jax.random.uniform(ks[0], (B, T, NX, NY), jnp.float32, 0.5, 1.0),
        "perm": jax.random.uniform(ks[1], (B, 1, NX, NY), jnp.float32,
                                   CFG["LUB"], CFG["HUB"]),
        "Q": jax.random.uniform(ks[2], (B, 1, NX, NY), jnp.float32, 0.0, 1.0),
        "Qw": jax.random.uniform(ks[3], (B, 1, NX, NY), jnp.float32, 0.0, 1.0),
        "Time": jax.random.uniform(ks[4], (B, 1, NX, NY), jnp.float32, 0.1, 1.0),
        "Pini": jnp.ones((B, 1, NX, NY), jnp.float32),
        "Phi": jax.random.uniform(ks[5], (B, 1, NX, NY), jnp.float32, 0.05, 0.35),
        "Swini": jnp.full((B, 1, NX, NY), 0.2, jnp.float32),
        "water_sat": jax.random.uniform(ks[6], (B, T, NX, NY), jnp.float32, 0.2, 0.8),
    }

    out = black_oil_pallas(input_var)
    jax.block_until_ready(out)

    p_ref, s_ref = black_oil_reference(input_var)
    np.testing.assert_allclose(np.asarray(out["pressured"]), np.asarray(p_ref),
                               rtol=1e-3, atol=2e-6)
    np.testing.assert_allclose(np.asarray(out["saturationd"]), np.asarray(s_ref),
                               rtol=1e-3, atol=2e-6)
    print("KERNEL_OK")
</pallas_src>

<mosaic_0001>
module attributes {stable_mosaic.version = 11 : i64} {
  func.func @kernel(%arg0: i32, %arg1: memref<1x1xf32, #tpu.memory_space<smem>>, %arg2: memref<1x4x1024xf32, #tpu.memory_space<vmem>>, %arg3: memref<1x4x1024xf32, #tpu.memory_space<vmem>>, %arg4: memref<1x5x1024xf32, #tpu.memory_space<vmem>>, %arg5: memref<1x4x1024xf32, #tpu.memory_space<vmem>>, %arg6: memref<1x4x1024xf32, #tpu.memory_space<vmem>>) attributes {dimension_semantics = [#tpu.dimension_semantics<parallel>], iteration_bounds = array<i64: 2>, scalar_prefetch = 0 : i64, scratch_operands = 0 : i64, tpu.core_type = #tpu.core_type<tc>, window_params = [{transform_indices = @transform_0, window_bounds = array<i64: 1, 1>}, {transform_indices = @transform_1, window_bounds = array<i64: 1, 4, 1024>}, {transform_indices = @transform_2, window_bounds = array<i64: 1, 4, 1024>}, {transform_indices = @transform_3, window_bounds = array<i64: 1, 5, 1024>}, {transform_indices = @transform_4, window_bounds = array<i64: 1, 4, 1024>}, {transform_indices = @transform_5, window_bounds = array<i64: 1, 4, 1024>}]} {
    %c0 = arith.constant 0 : index
    %c0_0 = arith.constant 0 : index
    %0 = memref.load %arg1[%c0, %c0_0] : memref<1x1xf32, #tpu.memory_space<smem>>
    %1 = tpu.iota {dimensions = array<i32: 1>} : vector<1x1024xi32>
    %c32_i32 = arith.constant 32 : i32
    %c0_i32 = arith.constant 0 : i32
    %2 = arith.cmpi eq, %c32_i32, %c0_i32 : i32
    %c1_i32 = arith.constant 1 : i32
    %3 = arith.select %2, %c1_i32, %c32_i32 : i32
    %4 = vector.broadcast %3 : i32 to vector<1x1024xi32>
    %5 = arith.remsi %1, %4 : vector<1x1024xi32>
    %c0_i32_1 = arith.constant 0 : i32
    %6 = vector.broadcast %c0_i32_1 : i32 to vector<1x1024xi32>
    %7 = arith.cmpi ne, %5, %6 : vector<1x1024xi32>
    %c0_i32_2 = arith.constant 0 : i32
    %8 = vector.broadcast %c0_i32_2 : i32 to vector<1x1024xi32>
    %9 = arith.cmpi slt, %5, %8 : vector<1x1024xi32>
    %c0_i32_3 = arith.constant 0 : i32
    %10 = arith.cmpi slt, %3, %c0_i32_3 : i32
    %11 = vector.broadcast %10 : i1 to vector<1x1024xi1>
    %12 = vector.broadcast %11 : vector<1x1024xi1> to vector<1x1024xi1>
    %13 = arith.xori %9, %12 : vector<1x1024xi1>
    %14 = arith.andi %13, %7 : vector<1x1024xi1>
    %15 = vector.broadcast %3 : i32 to vector<1x1024xi32>
    %16 = arith.addi %5, %15 : vector<1x1024xi32>
    %17 = arith.select %14, %16, %5 : vector<1x1024xi1>, vector<1x1024xi32>
    %c0_i32_4 = arith.constant 0 : i32
    %18 = vector.broadcast %c0_i32_4 : i32 to vector<1x1024xi32>
    %19 = arith.cmpi eq, %17, %18 : vector<1x1024xi32>
    %c31_i32 = arith.constant 31 : i32
    %20 = vector.broadcast %c31_i32 : i32 to vector<1x1024xi32>
    %21 = arith.cmpi eq, %17, %20 : vector<1x1024xi32>
    %c32_i32_5 = arith.constant 32 : i32
    %22 = vector.broadcast %c32_i32_5 : i32 to vector<1x1024xi32>
    %23 = arith.cmpi slt, %1, %22 : vector<1x1024xi32>
    %c992_i32 = arith.constant 992 : i32
    %24 = vector.broadcast %c992_i32 : i32 to vector<1x1024xi32>
    %25 = arith.cmpi sge, %1, %24 : vector<1x1024xi32>
    %c0_6 = arith.constant 0 : index
    %c0_7 = arith.constant 0 : index
    %c0_8 = arith.constant 0 : index
    %26 = vector.load %arg4[%c0_6, %c0_7, %c0_8] : memref<1x5x1024xf32, #tpu.memory_space<vmem>>, vector<1x1x1024xf32>
    %27 = vector.shape_cast %26 : vector<1x1x1024xf32> to vector<1x1024xf32>
    %c0_9 = arith.constant 0 : index
    %c1 = arith.constant 1 : index
    %c0_10 = arith.constant 0 : index
    %28 = vector.load %arg4[%c0_9, %c1, %c0_10] : memref<1x5x1024xf32, #tpu.memory_space<vmem>>, vector<1x1x1024xf32>
    %29 = vector.shape_cast %28 : vector<1x1x1024xf32> to vector<1x1024xf32>
    %c0_11 = arith.constant 0 : index
    %c2 = arith.constant 2 : index
    %c0_12 = arith.constant 0 : index
    %30 = vector.load %arg4[%c0_11, %c2, %c0_12] : memref<1x5x1024xf32, #tpu.memory_space<vmem>>, vector<1x1x1024xf32>
    %31 = vector.shape_cast %30 : vector<1x1x1024xf32> to vector<1x1024xf32>
    %c0_13 = arith.constant 0 : index
    %c3 = arith.constant 3 : index
    %c0_14 = arith.constant 0 : index
    %32 = vector.load %arg4[%c0_13, %c3, %c0_14] : memref<1x5x1024xf32, #tpu.memory_space<vmem>>, vector<1x1x1024xf32>
    %33 = vector.shape_cast %32 : vector<1x1x1024xf32> to vector<1x1024xf32>
    %c0_15 = arith.constant 0 : index
    %c4 = arith.constant 4 : index
    %c0_16 = arith.constant 0 : index
    %34 = vector.load %arg4[%c0_15, %c4, %c0_16] : memref<1x5x1024xf32, #tpu.memory_space<vmem>>, vector<1x1x1024xf32>
    %35 = vector.shape_cast %34 : vector<1x1x1024xf32> to vector<1x1024xf32>
    %cst = arith.constant 5.000000e+02 : f32
    %36 = vector.broadcast %cst : f32 to vector<1x1024xf32>
    %37 = arith.mulf %36, %27 : vector<1x1024xf32>
    %cst_17 = arith.constant 0.000000e+00 : f32
    %38 = vector.broadcast %cst_17 : f32 to vector<1x1024xf32>
    %39 = arith.addf %37, %38 : vector<1x1024xf32>
    %c1_i32_18 = arith.constant 1 : i32
    %40 = tpu.dynamic_rotate %27 by %c1_i32_18 dim 1 : vector<1x1024xf32>, i32 -> vector<1x1024xf32>
    %41 = arith.select %19, %27, %40 : vector<1x1024xi1>, vector<1x1024xf32>
    %c1023_i32 = arith.constant 1023 : i32
    %42 = tpu.dynamic_rotate %27 by %c1023_i32 dim 1 : vector<1x1024xf32>, i32 -> vector<1x1024xf32>
    %43 = arith.select %21, %27, %42 : vector<1x1024xi1>, vector<1x1024xf32>
    %c32_i32_19 = arith.constant 32 : i32
    %44 = tpu.dynamic_rotate %27 by %c32_i32_19 dim 1 : vector<1x1024xf32>, i32 -> vector<1x1024xf32>
    %45 = arith.select %23, %27, %44 : vector<1x1024xi1>, vector<1x1024xf32>
    %c992_i32_20 = arith.constant 992 : i32
    %46 = tpu.dynamic_rotate %27 by %c992_i32_20 dim 1 : vector<1x1024xf32>, i32 -> vector<1x1024xf32>
    %47 = arith.select %25, %27, %46 : vector<1x1024xi1>, vector<1x1024xf32>
    %cst_21 = arith.constant 1.000000e-01 : f32
    %48 = arith.subf %0, %cst_21 : f32
    %cst_22 = arith.constant 1.250000e+00 : f32
    %49 = arith.mulf %48, %cst_22 : f32
    %50 = arith.mulf %49, %49 : f32
    %cst_23 = arith.constant 1.000000e+00 : f32
    %51 = arith.mulf %50, %cst_23 : f32
    %cst_24 = arith.constant 1.000000e+00 : f32
    %52 = arith.subf %cst_24, %49 : f32
    %cst_25 = arith.constant 1.000000e+00 : f32
    %53 = arith.subf %cst_25, %49 : f32
    %54 = arith.mulf %52, %53 : f32
    %cst_26 = arith.constant 0.363636374 : f32
    %55 = arith.mulf %54, %cst_26 : f32
    %56 = arith.addf %51, %55 : f32
    %cst_27 = arith.constant 2.500000e-05 : f32
    %57 = arith.mulf %56, %cst_27 : f32
    %58 = arith.subf %47, %45 : vector<1x1024xf32>
    %59 = vector.broadcast %57 : f32 to vector<1x1024xf32>
    %60 = arith.mulf %59, %58 : vector<1x1024xf32>
    %cst_28 = arith.constant 2.500000e-05 : f32
    %61 = arith.mulf %56, %cst_28 : f32
    %62 = arith.subf %43, %41 : vector<1x1024xf32>
    %63 = vector.broadcast %61 : f32 to vector<1x1024xf32>
    %64 = arith.mulf %63, %62 : vector<1x1024xf32>
    %cst_29 = arith.constant 2.500000e-05 : f32
    %65 = arith.mulf %51, %cst_29 : f32
    %66 = arith.subf %47, %45 : vector<1x1024xf32>
    %67 = vector.broadcast %65 : f32 to vector<1x1024xf32>
    %68 = arith.mulf %67, %66 : vector<1x1024xf32>
    %cst_30 = arith.constant 2.500000e-05 : f32
    %69 = arith.mulf %51, %cst_30 : f32
    %70 = arith.subf %43, %41 : vector<1x1024xf32>
    %71 = vector.broadcast %69 : f32 to vector<1x1024xf32>
    %72 = arith.mulf %71, %70 : vector<1x1024xf32>
    %cst_31 = arith.constant 1.562500e-05 : f32
    %73 = vector.broadcast %cst_31 : f32 to vector<1x1024xf32>
    %74 = arith.mulf %29, %73 : vector<1x1024xf32>
    %cst_32 = arith.constant 1.562500e-05 : f32
    %75 = vector.broadcast %cst_32 : f32 to vector<1x1024xf32>
    %76 = arith.mulf %31, %75 : vector<1x1024xf32>
    %cst_33 = arith.constant 5.20833322E-13 : f32
    %77 = vector.broadcast %cst_33 : f32 to vector<1x1024xf32>
    %78 = arith.mulf %35, %77 : vector<1x1024xf32>
    %79 = arith.divf %78, %33 : vector<1x1024xf32>
    %c0_34 = arith.constant 0 : index
    %c0_35 = arith.constant 0 : index
    %c0_36 = arith.constant 0 : index
    %80 = vector.load %arg2[%c0_34, %c0_35, %c0_36] : memref<1x4x1024xf32, #tpu.memory_space<vmem>>, vector<1x1x1024xf32>
    %81 = vector.shape_cast %80 : vector<1x1x1024xf32> to vector<1x1024xf32>
    %c0_37 = arith.constant 0 : index
    %c0_38 = arith.constant 0 : index
    %c0_39 = arith.constant 0 : index
    %82 = vector.load %arg3[%c0_37, %c0_38, %c0_39] : memref<1x4x1024xf32, #tpu.memory_space<vmem>>, vector<1x1x1024xf32>
    %83 = vector.shape_cast %82 : vector<1x1x1024xf32> to vector<1x1024xf32>
    %c1_i32_40 = arith.constant 1 : i32
    %84 = tpu.dynamic_rotate %81 by %c1_i32_40 dim 1 : vector<1x1024xf32>, i32 -> vector<1x1024xf32>
    %85 = arith.select %19, %81, %84 : vector<1x1024xi1>, vector<1x1024xf32>
    %c1023_i32_41 = arith.constant 1023 : i32
    %86 = tpu.dynamic_rotate %81 by %c1023_i32_41 dim 1 : vector<1x1024xf32>, i32 -> vector<1x1024xf32>
    %87 = arith.select %21, %81, %86 : vector<1x1024xi1>, vector<1x1024xf32>
    %c32_i32_42 = arith.constant 32 : i32
    %88 = tpu.dynamic_rotate %81 by %c32_i32_42 dim 1 : vector<1x1024xf32>, i32 -> vector<1x1024xf32>
    %89 = arith.select %23, %81, %88 : vector<1x1024xi1>, vector<1x1024xf32>
    %c992_i32_43 = arith.constant 992 : i32
    %90 = tpu.dynamic_rotate %81 by %c992_i32_43 dim 1 : vector<1x1024xf32>, i32 -> vector<1x1024xf32>
    %91 = arith.select %25, %81, %90 : vector<1x1024xi1>, vector<1x1024xf32>
    %92 = arith.subf %91, %89 : vector<1x1024xf32>
    %cst_44 = arith.constant 9.600000e+03 : f32
    %93 = vector.broadcast %cst_44 : f32 to vector<1x1024xf32>
    %94 = arith.mulf %92, %93 : vector<1x1024xf32>
    %95 = arith.subf %87, %85 : vector<1x1024xf32>
    %cst_45 = arith.constant 9.600000e+03 : f32
    %96 = vector.broadcast %cst_45 : f32 to vector<1x1024xf32>
    %97 = arith.mulf %95, %96 : vector<1x1024xf32>
    %98 = arith.addf %91, %89 : vector<1x1024xf32>
    %99 = arith.addf %98, %87 : vector<1x1024xf32>
    %100 = arith.addf %99, %85 : vector<1x1024xf32>
    %cst_46 = arith.constant 4.000000e+00 : f32
    %101 = vector.broadcast %cst_46 : f32 to vector<1x1024xf32>
    %102 = arith.mulf %101, %81 : vector<1x1024xf32>
    %103 = arith.subf %100, %102 : vector<1x1024xf32>
    %cst_47 = arith.constant 1.920000e-03 : f32
    %104 = vector.broadcast %cst_47 : f32 to vector<1x1024xf32>
    %105 = arith.mulf %103, %104 : vector<1x1024xf32>
    %106 = vector.broadcast %0 : f32 to vector<1x1024xf32>
    %107 = arith.subf %83, %106 : vector<1x1024xf32>
    %cst_48 = arith.constant 1.000000e-03 : f32
    %108 = vector.broadcast %cst_48 : f32 to vector<1x1024xf32>
    %109 = arith.maximumf %107, %108 : vector<1x1024xf32>
    %110 = vector.broadcast %56 : f32 to vector<1x1024xf32>
    %111 = arith.mulf %110, %39 : vector<1x1024xf32>
    %112 = vector.broadcast %51 : f32 to vector<1x1024xf32>
    %113 = arith.mulf %112, %39 : vector<1x1024xf32>
    %114 = arith.mulf %60, %94 : vector<1x1024xf32>
    %115 = arith.addf %74, %114 : vector<1x1024xf32>
    %116 = arith.mulf %64, %97 : vector<1x1024xf32>
    %117 = arith.addf %115, %116 : vector<1x1024xf32>
    %118 = arith.mulf %111, %105 : vector<1x1024xf32>
    %119 = arith.addf %117, %118 : vector<1x1024xf32>
    %120 = arith.mulf %79, %109 : vector<1x1024xf32>
    %121 = arith.mulf %68, %94 : vector<1x1024xf32>
    %122 = arith.mulf %72, %97 : vector<1x1024xf32>
    %123 = arith.addf %121, %122 : vector<1x1024xf32>
    %124 = arith.mulf %113, %105 : vector<1x1024xf32>
    %125 = arith.addf %123, %124 : vector<1x1024xf32>
    %126 = arith.addf %125, %76 : vector<1x1024xf32>
    %127 = arith.subf %120, %126 : vector<1x1024xf32>
    %c0_49 = arith.constant 0 : index
    %c0_50 = arith.constant 0 : index
    %c0_51 = arith.constant 0 : index
    %128 = vector.load %arg5[%c0_49, %c0_50, %c0_51] : memref<1x4x1024xf32, #tpu.memory_space<vmem>>, vector<1x1x1024xf32>
    %129 = vector.shape_cast %128 : vector<1x1x1024xf32> to vector<1x1024xf32>
    %130 = vector.shape_cast %119 : vector<1x1024xf32> to vector<1x1x1024xf32>
    tpu.vector_store %arg5[%c0_49, %c0_50, %c0_51], %130 {strides = array<i32>} : memref<1x4x1024xf32, #tpu.memory_space<vmem>>, vector<1x1x1024xf32>,
    %c0_52 = arith.constant 0 : index
    %c0_53 = arith.constant 0 : index
    %c0_54 = arith.constant 0 : index
    %131 = vector.load %arg6[%c0_52, %c0_53, %c0_54] : memref<1x4x1024xf32, #tpu.memory_space<vmem>>, vector<1x1x1024xf32>
    %132 = vector.shape_cast %131 : vector<1x1x1024xf32> to vector<1x1024xf32>
    %133 = vector.shape_cast %127 : vector<1x1024xf32> to vector<1x1x1024xf32>
    tpu.vector_store %arg6[%c0_52, %c0_53, %c0_54], %133 {strides = array<i32>} : memref<1x4x1024xf32, #tpu.memory_space<vmem>>, vector<1x1x1024xf32>,
    %c0_55 = arith.constant 0 : index
    %c1_56 = arith.constant 1 : index
    %c0_57 = arith.constant 0 : index
    %134 = vector.load %arg2[%c0_55, %c1_56, %c0_57] : memref<1x4x1024xf32, #tpu.memory_space<vmem>>, vector<1x3x1024xf32>
    %135 = vector.shape_cast %134 : vector<1x3x1024xf32> to vector<3x1024xf32>
    %c0_58 = arith.constant 0 : index
    %c0_59 = arith.constant 0 : index
    %c0_60 = arith.constant 0 : index
    %136 = vector.load %arg3[%c0_58, %c0_59, %c0_60] : memref<1x4x1024xf32, #tpu.memory_space<vmem>>, vector<1x3x1024xf32>
    %137 = vector.shape_cast %136 : vector<1x3x1024xf32> to vector<3x1024xf32>
    %c0_61 = arith.constant 0 : index
    %c1_62 = arith.constant 1 : index
    %c0_63 = arith.constant 0 : index
    %138 = vector.load %arg3[%c0_61, %c1_62, %c0_63] : memref<1x4x1024xf32, #tpu.memory_space<vmem>>, vector<1x3x1024xf32>
    %139 = vector.shape_cast %138 : vector<1x3x1024xf32> to vector<3x1024xf32>
    %c1_i32_64 = arith.constant 1 : i32
    %140 = tpu.dynamic_rotate %135 by %c1_i32_64 dim 1 : vector<3x1024xf32>, i32 -> vector<3x1024xf32>
    %141 = vector.shape_cast %19 : vector<1x1024xi1> to vector<1x1024xi1>
    %142 = vector.broadcast %141 : vector<1x1024xi1> to vector<3x1024xi1>
    %143 = arith.select %142, %135, %140 : vector<3x1024xi1>, vector<3x1024xf32>
    %c1023_i32_65 = arith.constant 1023 : i32
    %144 = tpu.dynamic_rotate %135 by %c1023_i32_65 dim 1 : vector<3x1024xf32>, i32 -> vector<3x1024xf32>
    %145 = vector.shape_cast %21 : vector<1x1024xi1> to vector<1x1024xi1>
    %146 = vector.broadcast %145 : vector<1x1024xi1> to vector<3x1024xi1>
    %147 = arith.select %146, %135, %144 : vector<3x1024xi1>, vector<3x1024xf32>
    %c32_i32_66 = arith.constant 32 : i32
    %148 = tpu.dynamic_rotate %135 by %c32_i32_66 dim 1 : vector<3x1024xf32>, i32 -> vector<3x1024xf32>
    %149 = vector.shape_cast %23 : vector<1x1024xi1> to vector<1x1024xi1>
    %150 = vector.broadcast %149 : vector<1x1024xi1> to vector<3x1024xi1>
    %151 = arith.select %150, %135, %148 : vector<3x1024xi1>, vector<3x1024xf32>
    %c992_i32_67 = arith.constant 992 : i32
    %152 = tpu.dynamic_rotate %135 by %c992_i32_67 dim 1 : vector<3x1024xf32>, i32 -> vector<3x1024xf32>
    %153 = vector.shape_cast %25 : vector<1x1024xi1> to vector<1x1024xi1>
    %154 = vector.broadcast %153 : vector<1x1024xi1> to vector<3x1024xi1>
    %155 = arith.select %154, %135, %152 : vector<3x1024xi1>, vector<3x1024xf32>
    %156 = arith.subf %155, %151 : vector<3x1024xf32>
    %cst_68 = arith.constant 9.600000e+03 : f32
    %157 = vector.broadcast %cst_68 : f32 to vector<3x1024xf32>
    %158 = arith.mulf %156, %157 : vector<3x1024xf32>
    %159 = arith.subf %147, %143 : vector<3x1024xf32>
    %cst_69 = arith.constant 9.600000e+03 : f32
    %160 = vector.broadcast %cst_69 : f32 to vector<3x1024xf32>
    %161 = arith.mulf %159, %160 : vector<3x1024xf32>
    %162 = arith.addf %155, %151 : vector<3x1024xf32>
    %163 = arith.addf %162, %147 : vector<3x1024xf32>
    %164 = arith.addf %163, %143 : vector<3x1024xf32>
    %cst_70 = arith.constant 4.000000e+00 : f32
    %165 = vector.broadcast %cst_70 : f32 to vector<3x1024xf32>
    %166 = arith.mulf %165, %135 : vector<3x1024xf32>
    %167 = arith.subf %164, %166 : vector<3x1024xf32>
    %cst_71 = arith.constant 1.920000e-03 : f32
    %168 = vector.broadcast %cst_71 : f32 to vector<3x1024xf32>
    %169 = arith.mulf %167, %168 : vector<3x1024xf32>
    %cst_72 = arith.constant 1.000000e-01 : f32
    %170 = vector.broadcast %cst_72 : f32 to vector<3x1024xf32>
    %171 = arith.subf %137, %170 : vector<3x1024xf32>
    %cst_73 = arith.constant 1.250000e+00 : f32
    %172 = vector.broadcast %cst_73 : f32 to vector<3x1024xf32>
    %173 = arith.mulf %171, %172 : vector<3x1024xf32>
    %174 = arith.mulf %173, %173 : vector<3x1024xf32>
    %cst_74 = arith.constant 1.000000e+00 : f32
    %175 = vector.broadcast %cst_74 : f32 to vector<3x1024xf32>
    %176 = arith.mulf %174, %175 : vector<3x1024xf32>
    %cst_75 = arith.constant 1.000000e+00 : f32
    %177 = vector.broadcast %cst_75 : f32 to vector<3x1024xf32>
    %178 = arith.subf %177, %173 : vector<3x1024xf32>
    %cst_76 = arith.constant 1.000000e+00 : f32
    %179 = vector.broadcast %cst_76 : f32 to vector<3x1024xf32>
    %180 = arith.subf %179, %173 : vector<3x1024xf32>
    %181 = arith.mulf %178, %180 : vector<3x1024xf32>
    %cst_77 = arith.constant 0.363636374 : f32
    %182 = vector.broadcast %cst_77 : f32 to vector<3x1024xf32>
    %183 = arith.mulf %181, %182 : vector<3x1024xf32>
    %184 = arith.addf %176, %183 : vector<3x1024xf32>
    %185 = vector.broadcast %39 : vector<1x1024xf32> to vector<3x1024xf32>
    %186 = arith.mulf %184, %185 : vector<3x1024xf32>
    %187 = vector.broadcast %39 : vector<1x1024xf32> to vector<3x1024xf32>
    %188 = arith.mulf %176, %187 : vector<3x1024xf32>
    %189 = arith.subf %139, %137 : vector<3x1024xf32>
    %cst_78 = arith.constant 1.000000e-03 : f32
    %190 = vector.broadcast %cst_78 : f32 to vector<3x1024xf32>
    %191 = arith.maximumf %189, %190 : vector<3x1024xf32>
    %192 = vector.broadcast %60 : vector<1x1024xf32> to vector<3x1024xf32>
    %193 = arith.mulf %192, %158 : vector<3x1024xf32>
    %194 = vector.broadcast %74 : vector<1x1024xf32> to vector<3x1024xf32>
    %195 = arith.addf %194, %193 : vector<3x1024xf32>
    %196 = vector.broadcast %64 : vector<1x1024xf32> to vector<3x1024xf32>
    %197 = arith.mulf %196, %161 : vector<3x1024xf32>
    %198 = arith.addf %195, %197 : vector<3x1024xf32>
    %199 = arith.mulf %186, %169 : vector<3x1024xf32>
    %200 = arith.addf %198, %199 : vector<3x1024xf32>
    %201 = vector.broadcast %79 : vector<1x1024xf32> to vector<3x1024xf32>
    %202 = arith.mulf %201, %191 : vector<3x1024xf32>
    %203 = vector.broadcast %68 : vector<1x1024xf32> to vector<3x1024xf32>
    %204 = arith.mulf %203, %158 : vector<3x1024xf32>
    %205 = vector.broadcast %72 : vector<1x1024xf32> to vector<3x1024xf32>
    %206 = arith.mulf %205, %161 : vector<3x1024xf32>
    %207 = arith.addf %204, %206 : vector<3x1024xf32>
    %208 = arith.mulf %188, %169 : vector<3x1024xf32>
    %209 = arith.addf %207, %208 : vector<3x1024xf32>
    %210 = vector.broadcast %76 : vector<1x1024xf32> to vector<3x1024xf32>
    %211 = arith.addf %209, %210 : vector<3x1024xf32>
    %212 = arith.subf %202, %211 : vector<3x1024xf32>
    %c0_79 = arith.constant 0 : index
    %c1_80 = arith.constant 1 : index
    %c0_81 = arith.constant 0 : index
    %213 = vector.load %arg5[%c0_79, %c1_80, %c0_81] : memref<1x4x1024xf32, #tpu.memory_space<vmem>>, vector<1x3x1024xf32>
    %214 = vector.shape_cast %213 : vector<1x3x1024xf32> to vector<3x1024xf32>
    %215 = vector.shape_cast %200 : vector<3x1024xf32> to vector<1x3x1024xf32>
    tpu.vector_store %arg5[%c0_79, %c1_80, %c0_81], %215 {strides = array<i32>} : memref<1x4x1024xf32, #tpu.memory_space<vmem>>, vector<1x3x1024xf32>,
    %c0_82 = arith.constant 0 : index
    %c1_83 = arith.constant 1 : index
    %c0_84 = arith.constant 0 : index
    %216 = vector.load %arg6[%c0_82, %c1_83, %c0_84] : memref<1x4x1024xf32, #tpu.memory_space<vmem>>, vector<1x3x1024xf32>
    %217 = vector.shape_cast %216 : vector<1x3x1024xf32> to vector<3x1024xf32>
    %218 = vector.shape_cast %212 : vector<3x1024xf32> to vector<1x3x1024xf32>
    tpu.vector_store %arg6[%c0_82, %c1_83, %c0_84], %218 {strides = array<i32>} : memref<1x4x1024xf32, #tpu.memory_space<vmem>>, vector<1x3x1024xf32>,
    return
  }
  func.func @transform_0(%arg0: i32) -> (i32, i32) {
    %c0_i32 = arith.constant 0 : i32
    %c0_i32_0 = arith.constant 0 : i32
    %c0_i32_1 = arith.constant 0 : i32
    return %c0_i32, %c0_i32_0 : i32, i32
  }
  func.func @transform_1(%arg0: i32) -> (i32, i32, i32) {
    %c0_i32 = arith.constant 0 : i32
    %c0_i32_0 = arith.constant 0 : i32
    %c0_i32_1 = arith.constant 0 : i32
    return %arg0, %c0_i32, %c0_i32_0 : i32, i32, i32
  }
  func.func @transform_2(%arg0: i32) -> (i32, i32, i32) {
    %c0_i32 = arith.constant 0 : i32
    %c0_i32_0 = arith.constant 0 : i32
    %c0_i32_1 = arith.constant 0 : i32
    return %arg0, %c0_i32, %c0_i32_0 : i32, i32, i32
  }
  func.func @transform_3(%arg0: i32) -> (i32, i32, i32) {
    %c0_i32 = arith.constant 0 : i32
    %c0_i32_0 = arith.constant 0 : i32
    %c0_i32_1 = arith.constant 0 : i32
    return %arg0, %c0_i32, %c0_i32_0 : i32, i32, i32
  }
  func.func @transform_4(%arg0: i32) -> (i32, i32, i32) {
    %c0_i32 = arith.constant 0 : i32
    %c0_i32_0 = arith.constant 0 : i32
    %c0_i32_1 = arith.constant 0 : i32
    return %arg0, %c0_i32, %c0_i32_0 : i32, i32, i32
  }
  func.func @transform_5(%arg0: i32) -> (i32, i32, i32) {
    %c0_i32 = arith.constant 0 : i32
    %c0_i32_0 = arith.constant 0 : i32
    %c0_i32_1 = arith.constant 0 : i32
    return %arg0, %c0_i32, %c0_i32_0 : i32, i32, i32
  }
}

</mosaic_0001>

<bundles_post_ra>
// kernel: tpu_custom_call.1
= control target key start
LH: loop header
LB: loop body
LE: loop exit
PB: predicated region body
PF: predicated region fallthrough
CT: control target
= control target key end

     0   :  { %s4752_s0 = inlined_call_operand.<no memory space> [shape: f32[1,1], index: 0, kind: input, shape index: {}]   ;;  %s4753_s1 = inlined_call_operand.vmem [shape: f32[2,4,1024], index: 1, kind: input, shape index: {}]   ;;  %s4754_s2 = inlined_call_operand.vmem [shape: f32[2,4,1024], index: 2, kind: input, shape index: {}]   ;;  %s4755_s3 = inlined_call_operand.vmem [shape: f32[2,5,1024], index: 3, kind: input, shape index: {}]   ;;  %s4756_s4 = inlined_call_operand.hbm [shape: f32[2,4,1024], index: 4, kind: output, shape index: {0}]   ;;  %s4757_s5 = inlined_call_operand.hbm [shape: f32[2,4,1024], index: 5, kind: output, shape index: {1}]  }
   0x1   :  { %11 = sst [smem:[#allocation2]] %s4752_s0 }
   0x2   :  { %12 = vsyncpa [#allocation4], 0 }
   0x3   :  { %14 = vsyncpa [#allocation4 + $0x1], 0 }
   0x4   :  { %15 = vsyncpa [#allocation6], 0 }
   0x5   :  { %17 = vsyncpa [#allocation6 + $0x1], 0  ;;  %s2570_s20 = smov 0   ;;  %s2572_s21 = smov 0  }
   0x6   :  { %s2574_s22 = smov 0   ;;  %s2576_s23 = smov 0  }
   0x7 LB: > { %s2591_s0 = sadd.s32 4294967295, %s2528_s23   ;;  %s2341_s24 = sadd.s32 4294967294, %s2528_s23   ;;  %s2528_s23 = sphi %s2576_s23, %s5391_s23   ;;  %s2524_s22 = sphi %s2574_s22, %s5390_s22   ;;  %s2520_s21 = sphi %s2572_s21, %s5389_s21   ;;  %s2516_s20 = sphi %s2570_s20, %s5388_s20  }
   0x8   : > { %s2595_s25 = sadd.s32 1, %s2528_s23   ;;  %s129_s26 = sadd.s32 1, %s2524_s22 }
   0x9   : > { %s126_s27 = ssub.s32 %s2528_s23, %s2595_s25  ;;  %p139_p0 = scmp.ne.s32.totalorder %s2524_s22, %s2520_s21 }
   0xa   : > { %p127_p1 = scmp.eq.s32.totalorder %s126_s27, 0  ;;  %p140_p2 = scmp.eq.s32.totalorder %s2591_s0, 1 }
   0xb   : > { %p145_p3 = scmp.ne.s32.totalorder %s2520_s21, %s2516_s20  ;;  %p146_p4 = scmp.eq.s32.totalorder %s2341_s24, 1 }
   0xc   : > { %s2606_s28 = scalar_select %p127_p1, %s2524_s22, %s129_s26  }
   0xd   : > { %p2608_p5 = por %p140_p2, %p139_p0  ;;  %p2612_p6 = por %p146_p4, %p145_p3 }
   0xe   : > { %p2344_p7 = scmp.ge.s32.totalorder %s2528_s23, 1  ;;  %p217_p8 = scmp.lt.s32.totalorder %s2528_s23, 3 }
  0x10   : > { %p218_p9 = pnand %p2344_p7, %p217_p8 }
  0x12   : > { %221 = sbr.rel (%p218_p9) target bundleno = 430 (0x1ae), region = 36 }
  0x19   : > { %p260_p10 = scmp.lt.s32.totalorder %s2591_s0, 1  ;;  %v276_v0 = vlaneseq  ;;  %s2530_s11 = smov 1   ;;  %v4936_v41 = vmov 0  ;;  %v4940_v45 = vmov 0  ;;  %v4943_v46 = vmov 0 }
  0x1a   : > { %s2531_s12 = smov 127   ;;  %s2532_s13 = smov 32   ;;  %v4946_v59 = vmov 0  ;;  %v4949_v60 = vmov 0  ;;  %v4960_v55 = vmov 0 }
  0x1b   : > { %s2620_s6 = scalar_select %p260_p10, %s2591_s0, 1  ;;  %v2623_v1 = vshrl.u32 %v276_v0, 7  ;;  %v2843_v30 = vand.u32 127, %v276_v0 }
  0x1c   : > { %s2533_s14 = smov 96   ;;  %s2905_s19 = sld [smem:[#allocation2]] }
  0x1d   : > { %s2376_s7 = sshll.u32 %s2620_s6, 6  ;;  %v2632_v2 = vsub.s32 0, %v2623_v1  ;;  %v2635_v3 = vsub.s32 2, %v2623_v1  ;;  %v2642_v7 = vsub.s32 3, %v2623_v1  ;;  %v2645_v8 = vsub.s32 1, %v2623_v1  ;;  %s2374_s15 = sshll.u32 %s2620_s6, 5 }
  0x1e   : > { %s2629_s10 = scalar_lea.vmem %s4755_s3, %s2376_s7  ;;  %v2668_v13 = vsub.s32 5, %v2623_v1  ;;  %v2671_v14 = vsub.s32 4, %v2623_v1  ;;  %v2686_v17 = vsub.s32 7, %v2623_v1  ;;  %v2689_v18 = vsub.s32 6, %v2623_v1  ;;  %s2753_s18 = scalar_lea.vmem %s4753_s1, %s2374_s15 }
  0x1f   : > { %4924 = vst [vmem:[#allocation9_spill] sm:$0xff] %v2635_v3  ;;  %v413_v4 = vld [vmem:[%s2629_s10] ss:$8 sm:$0xf]  ;;  %4925 = vst [vmem:[#allocation10_spill] sm:$0xff] %v2642_v7  ;;  %v2850_v31 = vadd.s32 384, %v2843_v30 }
  0x20   : > { %v414_v5 = vld [vmem:[%s2629_s10] ss:$8 sm:$0xf0]  ;;  %4926 = vst [vmem:[#allocation11_spill] sm:$0xff] %v2645_v8  ;;  %4927 = vst [vmem:[#allocation12_spill] sm:$0xff] %v2668_v13  ;;  %v2853_v32 = vadd.s32 128, %v2843_v30 }
  0x21   : > { %v2639_v6 = vor.u32 %v414_v5, %v413_v4  ;;  %4928 = vst [vmem:[#allocation13_spill] sm:$0xff] %v2671_v14  ;;  %4929 = vst [vmem:[#allocation14_spill] sm:$0xff] %v2686_v17  ;;  %v2760_v21 = vld [vmem:[%s2753_s18] ss:$4 sm:$0xff]  ;;  %v2856_v33 = vadd.s32 256, %v2843_v30  ;;  %v4760_v34 = vand.u32 31, %v2850_v31 }
  0x22   : > { %4930 = vst [vmem:[#allocation15_spill] sm:$0xff] %v2689_v18  ;;  %v2768_v22 = vrot.slane %v2760_v21, %v2645_v8  ;;  %v2772_v23 = vrot.slane %v2760_v21, %v2632_v2  ;;  %v2780_v24 = vrot.slane %v2760_v21, %v2642_v7  ;;  %v2784_v25 = vrot.slane %v2760_v21, %v2635_v3  ;;  %v2887_v44 = vld [vmem:[%s2753_s18 + $0x18] sm:$0xee]  ;;  %v2953_v63 = vld [vmem:[%s2753_s18] sm:$0xee]  ;;  %s4384_s6 = sand.u32 1, %s2520_s21  }
  0x23   : > { %v2649_v9 = vrot.slane %v2639_v6, %v2635_v3  ;;  %v2653_v10 = vrot.slane %v2639_v6, %v2632_v2  ;;  %v2661_v11 = vrot.slane %v2639_v6, %v2642_v7  ;;  %v2665_v12 = vrot.slane %v2639_v6, %v2645_v8  ;;  %4939 = vst [vmem:[#allocation22_spill] sm:$0xff] %v2887_v44  ;;  %s2361_s24 = sadd.f32 -0.1, %s2905_s19 }
  0x24   : > { %v2679_v15 = vrot.slane %v2639_v6, %v2668_v13  ;;  %v2683_v16 = vrot.slane %v2639_v6, %v2671_v14  ;;  %v2697_v19 = vrot.slane %v2639_v6, %v2686_v17  ;;  %v2701_v20 = vrot.slane %v2639_v6, %v2689_v18  ;;  %4931 = vst [vmem:[#allocation16_spill] sm:$0xff] %v2772_v23 }
  0x25   : > { %479 = vrot.lane.b32.xlu1 %v2649_v9, %s2530_s11  ;;  %475 = vrot.lane.b32.xlu0 %v2653_v10, %s2530_s11  ;;  %v2792_v26 = vrot.slane %v2760_v21, %v2668_v13  ;;  %v2796_v27 = vrot.slane %v2760_v21, %v2671_v14  ;;  %v2804_v28 = vrot.slane %v2760_v21, %v2686_v17  ;;  %v2864_v35 = vadd.s32 512, %v2843_v30  ;;  %s3032_s26 = smul.f32 1.25, %s2361_s24 }
  0x26   : > { %v2808_v29 = vrot.slane %v2760_v21, %v2689_v18  ;;  %v4764_v36 = vand.u32 31, %v2853_v32  ;;  %v4763_v37 = vand.u32 31, %v2856_v33  ;;  %v2869_v38 = vadd.s32 640, %v2843_v30 }
  0x27   : > { %4932 = vst [vmem:[#allocation17_spill] sm:$0xff] %v2792_v26  ;;  %4933 = vst [vmem:[#allocation18_spill] sm:$0xff] %v2796_v27  ;;  %vm2877_vm0 = vcmp.eq.s32.totalorder %v4760_v34, 0  ;;  %vm4785_vm1 = vcmp.lt.s32.totalorder %v2843_v30, 1  ;;  %v4759_v42 = vand.u32 31, %v2864_v35  ;;  %v2884_v43 = vadd.s32 768, %v2843_v30  ;;  %s3132_s8 = smul.f32 %s3032_s26, %s3032_s26 }
  0x28   : > { %4934 = vst [vmem:[#allocation19_spill] sm:$0xff] %v2804_v28  ;;  %4935 = vst [vmem:[#allocation20_spill] sm:$0xff] %v2808_v29  ;;  %v4937_v41 = vsel %vm2877_vm0, 4294967295, %v4936_v41  ;;  %vm2891_vm2 = vcmp.eq.s32.totalorder %v4764_v36, 0  ;;  %vm2897_vm3 = vcmp.eq.s32.totalorder %v4763_v37, 0  ;;  %v4758_v47 = vand.u32 31, %v2869_v38 }
  0x29   : > { %481 = vrot.lane.b32.xlu1 %v2661_v11, %s2530_s11  ;;  %477 = vrot.lane.b32.xlu0 %v2665_v12, %s2530_s11  ;;  %4938 = vst [vmem:[#allocation21_spill] sm:$0xff] %v4937_v41  ;;  %v4941_v45 = vsel %vm2891_vm2, 4294967295, %v4940_v45  ;;  %v4944_v46 = vsel %vm2897_vm3, 4294967295, %v4943_v46  ;;  %v2903_v48 = vadd.s32 896, %v2843_v30  ;;  %v1360_v54 = vcombine.high %v2887_v44, %v2887_v44  ;;  %s609_s27 = ssub.f32 1.0, %s3032_s26 }
  0x2a   : > { %4942 = vst [vmem:[#allocation23_spill] sm:$0xff] %v4941_v45  ;;  %4945 = vst [vmem:[#allocation24_spill] sm:$0xff] %v4944_v46  ;;  %v289_v58 = vand.u32 31, %v2843_v30  ;;  %vm2940_vm4 = vcmp.eq.s32.totalorder %v4759_v42, 0  ;;  %vm2946_vm5 = vcmp.eq.s32.totalorder %v4758_v47, 0  ;;  %v4761_v61 = vand.u32 31, %v2884_v43 }
  0x2b   : > { %v4947_v59 = vsel %vm2940_vm4, 4294967295, %v4946_v59  ;;  %v4950_v60 = vsel %vm2946_vm5, 4294967295, %v4949_v60  ;;  %v4762_v62 = vand.u32 31, %v2903_v48  ;;  %v2975_v47 = vrot.slane %v1360_v54, 1  ;;  %s3103_s7 = smul.f32 %s609_s27, %s609_s27 }
  0x2c   : > { %4948 = vst [vmem:[#allocation25_spill] sm:$0xff] %v4947_v59  ;;  %4951 = vst [vmem:[#allocation26_spill] sm:$0xff] %v4950_v60  ;;  %vm2980_vm6 = vcmp.eq.s32.totalorder %v289_v58, 0  ;;  %vm2986_vm7 = vcmp.eq.s32.totalorder %v4761_v61, 0  ;;  %vm4786_vm9 = vcmp.lt.s32.totalorder %v2843_v30, 127  ;;  %vm3025_vm10 = vcmp.eq.s32.totalorder %v289_v58, 31 }
  0x2d   : > { %485 = vrot.lane.b32.xlu1 %v2679_v15, %s2530_s11  ;;  %483 = vrot.lane.b32.xlu0 %v2683_v16, %s2530_s11  ;;  %4952 = vst [vmem:[#allocation27_spill] sm:$0xff] %v2975_v47  ;;  %vm2992_vm8 = vcmp.eq.s32.totalorder %v4762_v62, 0  ;;  %v1357_v62 = vcombine.high %v2953_v63, %v2953_v63  ;;  %s611_s9 = smul.f32 0.36363637, %s3103_s7 }
  0x2e   : > { %v4961_v55 = vsel %vm2992_vm8, 4294967295, %v4960_v55 }
  0x2f   : > { %4962 = vst [vmem:[#allocation31_spill] sm:$0xff] %v4961_v55  ;;  %v3046_v36 = vrot.slane %v1357_v62, 1  ;;  %s3190_s16 = sadd.f32 %s611_s9, %s3132_s8  ;;  %s2193_s9 = scalar_lea.sflag [#allocation4], %s4384_s6 }
  0x31   : > { %489 = vrot.lane.b32.xlu1 %v2697_v19, %s2530_s11  ;;  %487 = vrot.lane.b32.xlu0 %v2701_v20, %s2530_s11  ;;  %4968 = vst [vmem:[#allocation35_spill] sm:$0xff] %v3046_v36  ;;  %s613_s17 = smul.f32 2.5e-05, %s3190_s16 }
  0x35   : > { %510 = vrot.lane.b32.xlu1 %v2665_v12, %s2531_s12  ;;  %508 = vrot.lane.b32.xlu0 %v2653_v10, %s2531_s12 }
  0x39   : > { %514 = vrot.lane.b32.xlu1 %v2661_v11, %s2531_s12  ;;  %512 = vrot.lane.b32.xlu0 %v2649_v9, %s2531_s12 }
  0x3d   : > { %518 = vrot.lane.b32.xlu1 %v2679_v15, %s2531_s12  ;;  %516 = vrot.lane.b32.xlu0 %v2683_v16, %s2531_s12 }
  0x41   : > { %522 = vrot.lane.b32.xlu1 %v2697_v19, %s2531_s12  ;;  %520 = vrot.lane.b32.xlu0 %v2701_v20, %s2531_s12 }
  0x45   : > { %543 = vrot.lane.b32.xlu1 %v2665_v12, %s2532_s13  ;;  %541 = vrot.lane.b32.xlu0 %v2653_v10, %s2532_s13 }
  0x49   : > { %547 = vrot.lane.b32.xlu1 %v2661_v11, %s2532_s13  ;;  %545 = vrot.lane.b32.xlu0 %v2649_v9, %s2532_s13 }
  0x4d   : > { %551 = vrot.lane.b32.xlu1 %v2679_v15, %s2532_s13  ;;  %549 = vrot.lane.b32.xlu0 %v2683_v16, %s2532_s13 }
  0x51   : > { %555 = vrot.lane.b32.xlu1 %v2697_v19, %s2532_s13  ;;  %553 = vrot.lane.b32.xlu0 %v2701_v20, %s2532_s13 }
  0x55   : > { %575 = vrot.lane.b32.xlu1 %v2665_v12, %s2533_s14  ;;  %573 = vrot.lane.b32.xlu0 %v2653_v10, %s2533_s14 }
  0x59   : > { %579 = vrot.lane.b32.xlu1 %v2661_v11, %s2533_s14  ;;  %577 = vrot.lane.b32.xlu0 %v2649_v9, %s2533_s14 }
  0x5d   : > { %583 = vrot.lane.b32.xlu1 %v2679_v15, %s2533_s14  ;;  %581 = vrot.lane.b32.xlu0 %v2683_v16, %s2533_s14 }
  0x61   : > { %587 = vrot.lane.b32.xlu1 %v2697_v19, %s2533_s14  ;;  %585 = vrot.lane.b32.xlu0 %v2701_v20, %s2533_s14 }
  0x65   : > { %715 = vrot.lane.b32.xlu1 %v2768_v22, %s2530_s11  ;;  %713 = vrot.lane.b32.xlu0 %v2772_v23, %s2530_s11 }
  0x69   : > { %719 = vrot.lane.b32.xlu1 %v2780_v24, %s2530_s11  ;;  %717 = vrot.lane.b32.xlu0 %v2784_v25, %s2530_s11 }
  0x6d   : > { %723 = vrot.lane.b32.xlu1 %v2792_v26, %s2530_s11  ;;  %721 = vrot.lane.b32.xlu0 %v2796_v27, %s2530_s11 }
  0x71   : > { %727 = vrot.lane.b32.xlu1 %v2804_v28, %s2530_s11  ;;  %725 = vrot.lane.b32.xlu0 %v2808_v29, %s2530_s11 }
  0x75   : > { %747 = vrot.lane.b32.xlu1 %v2768_v22, %s2531_s12  ;;  %745 = vrot.lane.b32.xlu0 %v2772_v23, %s2531_s12 }
  0x79   : > { %751 = vrot.lane.b32.xlu1 %v2780_v24, %s2531_s12  ;;  %749 = vrot.lane.b32.xlu0 %v2784_v25, %s2531_s12 }
  0x7d   : > { %755 = vrot.lane.b32.xlu1 %v2792_v26, %s2531_s12  ;;  %753 = vrot.lane.b32.xlu0 %v2796_v27, %s2531_s12 }
  0x81   : > { %791 = vrot.lane.b32.xlu1 %v2804_v28, %s2532_s13  ;;  %777 = vrot.lane.b32.xlu0 %v2772_v23, %s2532_s13 }
  0x85   : > { %823 = vrot.lane.b32.xlu1 %v2804_v28, %s2533_s14  ;;  %809 = vrot.lane.b32.xlu0 %v2772_v23, %s2533_s14  ;;  %v4974_v23 = vand.u32 31, %v2856_v33 }
  0x87   : > { %vm3063_vm12 = vcmp.eq.s32.totalorder %v4974_v23, 31 }
  0x89   : > { %781 = vrot.lane.b32.xlu1 %v2784_v25, %s2532_s13  ;;  %779 = vrot.lane.b32.xlu0 %v2768_v22, %s2532_s13 }
  0x8d   : > { %785 = vrot.lane.b32.xlu1 %v2796_v27, %s2532_s13  ;;  %783 = vrot.lane.b32.xlu0 %v2780_v24, %s2532_s13 }
  0x91   : > { %789 = vrot.lane.b32.xlu1 %v2808_v29, %s2532_s13  ;;  %787 = vrot.lane.b32.xlu0 %v2792_v26, %s2532_s13 }
  0x95   : > { %813 = vrot.lane.b32.xlu1 %v2784_v25, %s2533_s14  ;;  %811 = vrot.lane.b32.xlu0 %v2768_v22, %s2533_s14 }
  0x97   : > { %v480_v39 = vpop.permute.xlu1 %479  ;;  %v476_v40 = vpop.permute.xlu0 %475 }
  0x99   : > { %817 = vrot.lane.b32.xlu1 %v2796_v27, %s2533_s14  ;;  %815 = vrot.lane.b32.xlu0 %v2780_v24, %s2533_s14 }
  0x9b   : > { %v482_v49 = vpop.permute.xlu1 %481  ;;  %v478_v50 = vpop.permute.xlu0 %477 }
  0x9c   : > { %v2909_v51 = vsel %vm4785_vm1, %v480_v39, %v482_v49  ;;  %v2913_v52 = vsel %vm4785_vm1, %v478_v50, %v480_v39  ;;  %v2917_v53 = vsel %vm4785_vm1, %v476_v40, %v478_v50  ;;  %v4957_v50 = vmov 0 }
  0x9d   : > { %821 = vrot.lane.b32.xlu1 %v2808_v29, %s2533_s14  ;;  %819 = vrot.lane.b32.xlu0 %v2792_v26, %s2533_s14  ;;  %v4958_v50 = vsel %vm2986_vm7, 4294967295, %v4957_v50  ;;  %v4975_v26 = vmov 0 }
  0x9e   : > { %4959 = vst [vmem:[#allocation30_spill] sm:$0xff] %v4958_v50  ;;  %v4976_v26 = vsel %vm3063_vm12, 4294967295, %v4975_v26 }
  0x9f   : > { %v486_v0 = vpop.permute.xlu1 %485  ;;  %v484_v4 = vpop.permute.xlu0 %483  ;;  %4977 = vst [vmem:[#allocation38_spill] sm:$0xff] %v4976_v26 }
  0xa0   : > { %v2957_v5 = vsel %vm4785_vm1, %v484_v4, %v486_v0  ;;  %v2961_v39 = vsel %vm4785_vm1, %v482_v49, %v484_v4  ;;  %v2978_v49 = vrot.slane %v2953_v63, 1  ;;  %v4954_v4 = vmov 0 }
  0xa1   : > { %759 = vrot.lane.b32.xlu1 %v2804_v28, %s2531_s12  ;;  %757 = vrot.lane.b32.xlu0 %v2808_v29, %s2531_s12  ;;  %v4955_v4 = vsel %vm2980_vm6, 4294967295, %v4954_v4  ;;  %v3049_v28 = vld [vmem:[%s2753_s18 + $0x10] sm:$0xee] }
  0xa2   : > { %4953 = vst [vmem:[#allocation28_spill] sm:$0xff] %v2978_v49  ;;  %4956 = vst [vmem:[#allocation29_spill] sm:$0xff] %v4955_v4 }
  0xa3   : > { %v490_v54 = vpop.permute.xlu1 %489  ;;  %v488_v42 = vpop.permute.xlu0 %487  ;;  %4969 = vst [vmem:[#allocation36_spill] sm:$0xff] %v3049_v28 }
  0xa4   : > { %v499_v34 = vsel %vm4785_vm1, %v490_v54, %v476_v40  ;;  %v3001_v57 = vsel %vm4785_vm1, %v488_v42, %v490_v54  ;;  %v3005_v61 = vsel %vm4785_vm1, %v486_v0, %v488_v42  ;;  %v3030_v42 = vld [vmem:[%s2753_s18 + $0x8] sm:$0xee] }
  0xa5   : > { %v500_v56 = vsel %vm2980_vm6, %v2653_v10, %v499_v34  ;;  %1487 = vrot.lane.b32.xlu1 %v2975_v47, %s2532_s13  ;;  %1473 = vrot.lane.b32.xlu0 %v2978_v49, %s2532_s13  ;;  %v4963_v34 = vmov 0  ;;  %4966 = vst [vmem:[#allocation33_spill] sm:$0xff] %v3030_v42  ;;  %v3044_v58 = vrot.slane %v3030_v42, 1  ;;  %v1358_v29 = vcombine.high %v3030_v42, %v3030_v42 }
  0xa6   : > { %v4964_v34 = vsel %vm3025_vm10, 4294967295, %v4963_v34 }
  0xa7   : > { %4965 = vst [vmem:[#allocation32_spill] sm:$0xff] %v4964_v34  ;;  %v511_v0 = vpop.permute.xlu1 %510  ;;  %v509_v40 = vpop.permute.xlu0 %508  ;;  %4967 = vst [vmem:[#allocation34_spill] sm:$0xff] %v3044_v58  ;;  %v4971_v34 = vmov 0 }
  0xa8   : > { %v531_v54 = vsel %vm4786_vm9, %v509_v40, %v511_v0 }
  0xa9   : > { %v533_v37 = vsel %vm3025_vm10, %v2653_v10, %v531_v54  ;;  %1535 = vrot.lane.b32.xlu1 %v2975_v47, %s2533_s14  ;;  %1521 = vrot.lane.b32.xlu0 %v2978_v49, %s2533_s14  ;;  %v4970_v54 = vand.u32 31, %v2853_v32  ;;  %v3073_v32 = vrot.slane %v3049_v28, 1 }
  0xaa   : > { %v3053_v4 = vsub.f32 %v533_v37, %v500_v56  ;;  %v3085_v56 = vrot.slane %v1358_v29, 1 }
  0xab   : > { %vm3057_vm11 = vcmp.eq.s32.totalorder %v4970_v54, 31  ;;  %v515_v62 = vpop.permute.xlu1 %514  ;;  %v513_v27 = vpop.permute.xlu0 %512  ;;  %4978 = vst [vmem:[#allocation39_spill] sm:$0xff] %v3073_v32 }
  0xac   : > { %v4972_v34 = vsel %vm3057_vm11, 4294967295, %v4971_v34  ;;  %v529_v42 = vsel %vm4786_vm9, %v513_v27, %v515_v62  ;;  %v530_v37 = vsel %vm4786_vm9, %v511_v0, %v513_v27  ;;  %4979 = vst [vmem:[#allocation40_spill] sm:$0xff] %v3085_v56  ;;  %v1359_v27 = vcombine.high %v3049_v28, %v3049_v28 }
  0xad   : > { %4973 = vst [vmem:[#allocation37_spill] sm:$0xff] %v4972_v34  ;;  %v534_v33 = vsel %vm3057_vm11, %v2665_v12, %v530_v37  ;;  %v535_v23 = vsel %vm3063_vm12, %v2649_v9, %v529_v42  ;;  %1477 = vrot.lane.b32.xlu1 %v3044_v58, %s2532_s13  ;;  %1475 = vrot.lane.b32.xlu0 %v3046_v36, %s2532_s13  ;;  %v4982_v28 = vand.u32 31, %v2850_v31  ;;  %v4983_v34 = vmov 0 }
  0xae   : > { %v4980_v0 = vsel %vm2891_vm2, %v2665_v12, %v2917_v53  ;;  %v4981_v42 = vsel %vm2897_vm3, %v2649_v9, %v2913_v52  ;;  %v4986_v12 = vand.u32 31, %v2864_v35  ;;  %v4987_v53 = vmov 0 }
  0xaf   : > { %v3094_v54 = vsub.f32 %v534_v33, %v4980_v0  ;;  %v3101_v37 = vsub.f32 %v535_v23, %v4981_v42  ;;  %v519_v29 = vpop.permute.xlu1 %518  ;;  %v517_v26 = vpop.permute.xlu0 %516  ;;  %vm3107_vm13 = vcmp.eq.s32.totalorder %v4982_v28, 31  ;;  %v3126_v28 = vrot.slane %v2887_v44, 1 }
  0xb0   : > { %v4984_v34 = vsel %vm3107_vm13, 4294967295, %v4983_v34  ;;  %vm3113_vm14 = vcmp.eq.s32.totalorder %v4986_v12, 31  ;;  %v527_v9 = vsel %vm4786_vm9, %v517_v26, %v519_v29  ;;  %v528_v52 = vsel %vm4786_vm9, %v515_v62, %v517_v26 }
  0xb1   : > { %4985 = vst [vmem:[#allocation41_spill] sm:$0xff] %v4984_v34  ;;  %v4988_v53 = vsel %vm3113_vm14, 4294967295, %v4987_v53  ;;  %1481 = vrot.lane.b32.xlu1 %v3073_v32, %s2532_s13  ;;  %1479 = vrot.lane.b32.xlu0 %v3085_v56, %s2532_s13  ;;  %4990 = vst [vmem:[#allocation43_spill] sm:$0xff] %v3126_v28  ;;  %v3128_v31 = vrot.slane %v1359_v27, 1  ;;  %v4992_v35 = vand.u32 31, %v2903_v48  ;;  %v4993_v33 = vmov 0 }
  0xb2   : > { %4989 = vst [vmem:[#allocation42_spill] sm:$0xff] %v4988_v53  ;;  %v4996_v26 = vand.u32 31, %v2884_v43  ;;  %v4997_v62 = vmov 0  ;;  %v536_v23 = vsel %vm3107_vm13, %v2661_v11, %v528_v52  ;;  %v537_v27 = vsel %vm3113_vm14, %v2683_v16, %v527_v9 }
  0xb3   : > { %4991 = vst [vmem:[#allocation44_spill] sm:$0xff] %v3128_v31  ;;  %vm3136_vm15 = vcmp.eq.s32.totalorder %v4992_v35, 31  ;;  %v523_v0 = vpop.permute.xlu1 %522  ;;  %v5000_v42 = vand.u32 31, %v2869_v38  ;;  %v5001_v12 = vmov 0  ;;  %v521_v43 = vpop.permute.xlu0 %520  ;;  %v5004_v35 = vsel %vm2877_vm0, %v2661_v11, %v2909_v51 }
  0xb4   : > { %v4994_v33 = vsel %vm3136_vm15, 4294967295, %v4993_v33  ;;  %vm3142_vm1 = vcmp.eq.s32.totalorder %v4996_v26, 31  ;;  %v3164_v26 = vsub.f32 %v536_v23, %v5004_v35  ;;  %v5005_v9 = vsel %vm2940_vm4, %v2683_v16, %v2961_v39 }
  0xb5   : > { %4995 = vst [vmem:[#allocation45_spill] sm:$0xff] %v4994_v33  ;;  %v4998_v62 = vsel %vm3142_vm1, 4294967295, %v4997_v62  ;;  %vm3155_vm9 = vcmp.eq.s32.totalorder %v5000_v42, 31  ;;  %v3171_v52 = vsub.f32 %v537_v27, %v5005_v9  ;;  %vm5006_vm14 = vcmp.lt.s32.totalorder %v2843_v30, 127  ;;  %1485 = vrot.lane.b32.xlu1 %v3126_v28, %s2532_s13  ;;  %1483 = vrot.lane.b32.xlu0 %v3128_v31, %s2532_s13  ;;  %s647_s13 = smul.f32 2.5e-05, %s3132_s8 }
  0xb6   : > { %4999 = vst [vmem:[#allocation46_spill] sm:$0xff] %v4998_v62  ;;  %v5002_v12 = vsel %vm3155_vm9, 4294967295, %v5001_v12  ;;  %v532_v38 = vsel %vm5006_vm14, %v523_v0, %v509_v40  ;;  %vm5007_vm13 = vmmov %vm5006_vm14  ;;  %v5009_v51 = vsel %vm2992_vm8, %v2697_v19, %v3001_v57  ;;  %v3246_v62 = vstv %s613_s17 }
  0xb7   : > { %5003 = vst [vmem:[#allocation47_spill] sm:$0xff] %v5002_v12  ;;  %v525_v42 = vsel %vm5007_vm13, %v521_v43, %v523_v0  ;;  %v540_v44 = vsel %vm3136_vm15, %v2697_v19, %v532_v38  ;;  %vm5008_vm12 = vmmov %vm5007_vm13  ;;  %v544_v27 = vpop.permute.xlu1 %543  ;;  %v542_v57 = vpop.permute.xlu0 %541  ;;  %v2534_v0 = vmov 1966171168   ;;  %v2355_v38 = vld [vmem:[%s2629_s10 + $0x2] ss:$8 sm:$0xf]  ;;  %v960_v33 = vstv %s3132_s8 }
  0xb8   : > { %v526_v11 = vsel %vm5008_vm12, %v519_v29, %v521_v43  ;;  %v539_v16 = vsel %vm3142_vm1, %v2701_v20, %v525_v42  ;;  %v3197_v39 = vsub.f32 %v540_v44, %v5009_v51  ;;  %v5010_v29 = vsel %vm2986_vm7, %v2701_v20, %v3005_v61  ;;  %v2356_v42 = vld [vmem:[%s2629_s10 + $0x2] ss:$8 sm:$0xf0]  ;;  %v2353_v51 = vld [vmem:[%s2629_s10 + $0x1] ss:$8 sm:$0xf] }
  0xb9   : > { %v538_v40 = vsel %vm3155_vm9, %v2679_v15, %v526_v11  ;;  %v3207_v23 = vsub.f32 %v539_v16, %v5010_v29  ;;  %vm4857_vm12 = vcmp.lt.s32.totalorder %v2843_v30, 32  ;;  %v983_v44 = vunpack.c.l.s4 %v2534_v0  ;;  %1525 = vrot.lane.b32.xlu1 %v3044_v58, %s2533_s14  ;;  %1523 = vrot.lane.b32.xlu0 %v3046_v36, %s2533_s14 }
  0xba   : > { %v5011_v43 = vsel %vm2946_vm5, %v2679_v15, %v2957_v5  ;;  %v3222_v20 = vsel %vm4857_vm12, %v542_v57, %v544_v27  ;;  %v3240_v16 = vmul.f32 4.0, %v2760_v21  ;;  %vm4839_vm13 = vcmp.lt.s32.totalorder %v2843_v30, 96 }
  0xbb   : > { %v3215_v35 = vsub.f32 %v538_v40, %v5011_v43  ;;  %v548_v61 = vpop.permute.xlu1 %547  ;;  %v546_v9 = vpop.permute.xlu0 %545  ;;  %v984_v11 = vunpack.c.0.s8 %v983_v44  ;;  %v2354_v40 = vld [vmem:[%s2629_s10 + $0x1] ss:$8 sm:$0xf0]  ;;  %v423_v43 = vor.u32 %v2356_v42, %v2355_v38  ;;  %v3281_v12 = vmul.f32 500.0, %v2639_v6 }
  0xbc   : > { %v3229_v15 = vsel %vm4857_vm12, %v546_v9, %v548_v61  ;;  %v3233_v5 = vsel %vm4857_vm12, %v544_v27, %v546_v9  ;;  %5012 = vst [vmem:[#allocation48_spill] sm:$0xff] %v3240_v16  ;;  %v3248_v27 = vstv %s647_s13  ;;  %v419_v38 = vor.u32 %v2354_v40, %v2353_v51  ;;  %s2535_s13 = smov [#allocation3]  }
  0xbd   : > { %1529 = vrot.lane.b32.xlu1 %v3073_v32, %s2533_s14  ;;  %1527 = vrot.lane.b32.xlu0 %v3085_v56, %s2533_s14  ;;  %v3259_v9 = vsub.s32 %v984_v11, %v2623_v1  ;;  %v3274_v11 = vmul.f32 %v3053_v4, %v3246_v62  ;;  %v3278_v51 = vmul.f32 %v3248_v27, %v3053_v4  ;;  %v3283_v42 = vmul.f32 1.5625e-05, %v423_v43  ;;  %v2358_v43 = vld [vmem:[%s2629_s10 + $0x3] ss:$8 sm:$0xf0]  ;;  %s2438_s17 = sshll.u32 %s2535_s13, 4  ;;  %s2439_s17 = int_to_ptr.vmem [resolvable:$false] %s2438_s17 }
  0xbe   : > { %v3328_v55 = vmul.f32 %v960_v33, %v3281_v12  ;;  %v3369_v16 = vmul.f32 %v3164_v26, %v3246_v62  ;;  %vm4831_vm14 = vcmp.ge.s32.totalorder %v2903_v48, 992  ;;  %v1709_v41 = vrot.slane %v3281_v12, %v2635_v3 }
  0xbf   : > { %v552_v29 = vpop.permute.xlu1 %551  ;;  %v550_v0 = vpop.permute.xlu0 %549  ;;  %5013 = vst [vmem:[#allocation49_spill] sm:$0xff] %v3259_v9  ;;  %5014 = vst [vmem:[#allocation50_spill] sm:$0xff] %v3274_v11  ;;  %v3343_v9 = vrot.slane %v3283_v42, %v2689_v18  ;;  %v3347_v33 = vrot.slane %v3283_v42, %v2686_v17 }
  0xc0   : > { %v3252_v44 = vsel %vm4857_vm12, %v550_v0, %v552_v29  ;;  %v3256_v21 = vsel %vm4857_vm12, %v548_v61, %v550_v0  ;;  %5015 = vst [vmem:[#allocation51_spill] sm:$0xff] %v3278_v51  ;;  %5018 = vst [vmem:[#allocation54_spill] sm:$0xff] %v3328_v55 }
  0xc1   : > { %1533 = vrot.lane.b32.xlu1 %v3126_v28, %s2533_s14  ;;  %1531 = vrot.lane.b32.xlu0 %v3128_v31, %s2533_s14  ;;  %5021 = vst [vmem:[#allocation57_spill] sm:$0xff] %v3343_v9  ;;  %5022 = vst [vmem:[#allocation58_spill] sm:$0xff] %v3347_v33  ;;  %v3363_v9 = vmul.f32 %v3248_v27, %v3101_v37  ;;  %s3527_s14 = scalar_lea.vmem %s4754_s2, %s2374_s15 }
  0xc2   : > { %5026 = vst [vmem:[#allocation62_spill] sm:$0xff] %v3369_v16 }
  0xc3   : > { %v556_v40 = vpop.permute.xlu1 %555  ;;  %v554_v0 = vpop.permute.xlu0 %553  ;;  %5025 = vst [vmem:[#allocation61_spill] sm:$0xff] %v3363_v9 }
  0xc4   : > { %v564_v1 = vsel %vm4857_vm12, %v556_v40, %v542_v57  ;;  %v3289_v61 = vsel %vm4857_vm12, %v554_v0, %v556_v40  ;;  %v3293_v4 = vsel %vm4857_vm12, %v552_v29, %v554_v0  ;;  %v3303_v57 = vmul.f32 1.5625e-05, %v419_v38 }
  0xc5   : > { %1427 = vrot.lane.b32.xlu1 %v3046_v36, %s2531_s12  ;;  %v565_v6 = vsel %vm4857_vm12, %v2653_v10, %v564_v1  ;;  %v3309_v29 = vmul.f32 %v3094_v54, %v3246_v62  ;;  %1425 = vrot.lane.b32.xlu0 %v2978_v49, %s2531_s12  ;;  %v2357_v1 = vld [vmem:[%s2629_s10 + $0x3] ss:$8 sm:$0xf]  ;;  %v3332_v10 = vrot.slane %v3283_v42, %v2671_v14 }
  0xc6   : > { %5016 = vst [vmem:[#allocation52_spill] sm:$0xff] %v3303_v57  ;;  %v3339_v40 = vrot.slane %v3283_v42, %v2668_v13  ;;  %v3351_v0 = vmul.f32 %v3101_v37, %v3246_v62  ;;  %v3383_v37 = vmul.f32 %v3248_v27, %v3171_v52 }
  0xc7   : > { %5017 = vst [vmem:[#allocation53_spill] sm:$0xff] %v3309_v29  ;;  %v576_v53 = vpop.permute.xlu1 %575  ;;  %v3325_v34 = vpop.permute.xlu0 %573  ;;  %5019 = vst [vmem:[#allocation55_spill] sm:$0xff] %v3332_v10  ;;  %v3355_v10 = vmul.f32 %v3248_v27, %v3094_v54  ;;  %v3373_v54 = vmul.f32 %v3171_v52, %v3246_v62  ;;  %v3395_v29 = vmul.f32 %v3207_v23, %v3246_v62 }
  0xc8   : > { %v596_v38 = vsel %vm4839_vm13, %v3325_v34, %v576_v53  ;;  %5020 = vst [vmem:[#allocation56_spill] sm:$0xff] %v3339_v40  ;;  %5023 = vst [vmem:[#allocation59_spill] sm:$0xff] %v3351_v0  ;;  %v427_v40 = vor.u32 %v2358_v43, %v2357_v1  ;;  %v3387_v43 = vmul.f32 %v3197_v39, %v3246_v62 }
  0xc9   : > { %5024 = vst [vmem:[#allocation60_spill] sm:$0xff] %v3355_v10  ;;  %v3357_v55 = vsub.f32 %v596_v38, %v565_v6  ;;  %1431 = vrot.lane.b32.xlu1 %v3085_v56, %s2531_s12  ;;  %5027 = vst [vmem:[#allocation63_spill] sm:$0xff] %v3373_v54  ;;  %1429 = vrot.lane.b32.xlu0 %v3044_v58, %s2531_s12  ;;  %v3379_v6 = vmul.f32 %v3248_v27, %v3164_v26 }
  0xca   : > { %5029 = vst [vmem:[#allocation65_spill] sm:$0xff] %v3383_v37  ;;  %5030 = vst [vmem:[#allocation66_spill] sm:$0xff] %v3387_v43  ;;  %v3391_v38 = vmul.f32 %v3248_v27, %v3197_v39  ;;  %v3399_v26 = vmul.f32 %v3248_v27, %v3207_v23  ;;  %v3408_v39 = vmul.f32 %v3215_v35, %v3246_v62  ;;  %2432 = vrcp.f32 %v427_v40 }
  0xcb   : > { %5028 = vst [vmem:[#allocation64_spill] sm:$0xff] %v3379_v6  ;;  %v580_v1 = vpop.permute.xlu1 %579  ;;  %v578_v33 = vpop.permute.xlu0 %577  ;;  %5032 = vst [vmem:[#allocation68_spill] sm:$0xff] %v3395_v29  ;;  %v1347_v29 = vld [vmem:[%s3527_s14 + $0x10] sm:$0x77] }
  0xcc   : > { %5031 = vst [vmem:[#allocation67_spill] sm:$0xff] %v3391_v38  ;;  %5033 = vst [vmem:[#allocation69_spill] sm:$0xff] %v3399_v26  ;;  %v594_v52 = vsel %vm4839_vm13, %v578_v33, %v580_v1  ;;  %v595_v51 = vsel %vm4839_vm13, %v576_v53, %v578_v33  ;;  %v2359_v33 = vld [vmem:[%s2629_s10 + $0x4] ss:$8 sm:$0xf] }
  0xcd   : > { %5034 = vst [vmem:[#allocation70_spill] sm:$0xff] %v3408_v39  ;;  %v3411_v11 = vsub.f32 %v595_v51, %v3222_v20  ;;  %v3414_v23 = vsub.f32 %v594_v52, %v3233_v5  ;;  %1435 = vrot.lane.b32.xlu1 %v3128_v31, %s2531_s12  ;;  %1433 = vrot.lane.b32.xlu0 %v3073_v32, %s2531_s12  ;;  %v2360_v20 = vld [vmem:[%s2629_s10 + $0x4] ss:$8 sm:$0xf0]  ;;  %s2440_s10 = scalar_lea.vmem %s2439_s17, 1024 }
  0xce   : > { %v3436_v52 = vmul.f32 %v3248_v27, %v3215_v35  ;;  %v3467_v35 = vmul.f32 4.0, %v2953_v63  ;;  %v431_v6 = vor.u32 %v2360_v20, %v2359_v33  ;;  %v958_v33 = vstv %s3190_s16  ;;  %v5057_v26 = vld [vmem:[#allocation17_spill] sm:$0xff]  ;;  %v5064_v39 = vld [vmem:[#allocation16_spill] sm:$0xff] }
  0xcf   : > { %v584_v50 = vpop.permute.xlu1 %583  ;;  %v582_v53 = vpop.permute.xlu0 %581  ;;  %v3497_v20 = vmul.f32 %v3246_v62, %v3357_v55  ;;  %v5066_v38 = vld [vmem:[#allocation20_spill] sm:$0xff] }
  0xd0   : > { %5035 = vst [vmem:[#allocation71_spill] sm:$0xff] %v3436_v52  ;;  %v592_v5 = vsel %vm4839_vm13, %v582_v53, %v584_v50  ;;  %v593_v51 = vsel %vm4839_vm13, %v580_v1, %v582_v53  ;;  %5036 = vst [vmem:[#allocation72_spill] sm:$0xff] %v3467_v35 }
  0xd1   : > { %1439 = vrot.lane.b32.xlu1 %v2975_v47, %s2531_s12  ;;  %v3459_v1 = vsub.f32 %v593_v51, %v3229_v15  ;;  %v3462_v53 = vsub.f32 %v592_v5, %v3256_v21  ;;  %1437 = vrot.lane.b32.xlu0 %v3126_v28, %s2531_s12  ;;  %v667_v51 = vmul.f32 5.208333e-13, %v431_v6 }
  0xd3   : > { %v588_v37 = vpop.permute.xlu1 %587  ;;  %v586_v40 = vpop.permute.xlu0 %585 }
  0xd4   : > { %v597_v16 = vsel %vm4839_vm13, %v588_v37, %v3325_v34  ;;  %v590_v15 = vsel %vm4839_vm13, %v586_v40, %v588_v37  ;;  %v591_v63 = vsel %vm4839_vm13, %v584_v50, %v586_v40  ;;  %v1633_v34 = vcombine.high %v3467_v35, %v3467_v35  ;;  %v2433_v50 = vpop.eup %2432 }
  0xd5   : > { %1379 = vrot.lane.b32.xlu1 %v3046_v36, %s2530_s11  ;;  %1377 = vrot.lane.b32.xlu0 %v2978_v49, %s2530_s11  ;;  %v3505_v37 = vrot.slane %v3283_v42, %v2635_v3  ;;  %v3509_v40 = vmul.f32 %v3248_v27, %v3357_v55  ;;  %v605_v5 = vsel %vm4831_vm14, %v2697_v19, %v597_v16  ;;  %vm5038_vm14 = vcmp.lt.s32.totalorder %v2843_v30, 1 }
  0xd6   : > { %v3515_v21 = vsub.f32 %v591_v63, %v3252_v44  ;;  %v3518_v36 = vsub.f32 %v590_v15, %v3293_v4  ;;  %v3531_v55 = vmul.f32 %v3246_v62, %v3411_v11  ;;  %v3535_v19 = vmul.f32 %v3246_v62, %v3414_v23  ;;  %v1346_v4 = vld [vmem:[%s3527_s14 + $0x8] sm:$0x77]  ;;  %vm5046_vm13 = vmmov %vm5038_vm14 }
  0xd7   : > { %5037 = vst [vmem:[#allocation73_spill] sm:$0xff] %v3505_v37  ;;  %v716_v6 = vpop.permute.xlu1 %715  ;;  %v3520_v57 = vpop.permute.xlu0 %713  ;;  %v3538_v16 = vsub.f32 %v605_v5, %v3289_v61  ;;  %v3548_v15 = vrot.slane %v3283_v42, %v2642_v7  ;;  %v3552_v63 = vrot.slane %v3283_v42, %v2632_v2  ;;  %v3556_v61 = vrot.slane %v3283_v42, %v2645_v8  ;;  %vm5063_vm12 = vmmov %vm5046_vm13 }
  0xd8   : > { %v735_v44 = vsel %vm5038_vm14, %v3520_v57, %v716_v6  ;;  %v3559_v5 = vmul.f32 %v958_v33, %v3281_v12  ;;  %v3563_v37 = vmul.f32 %v3248_v27, %v3411_v11  ;;  %v3582_v11 = vmul.f32 %v3248_v27, %v3414_v23 }
  0xd9   : > { %1383 = vrot.lane.b32.xlu1 %v3085_v56, %s2530_s11  ;;  %5039 = vst [vmem:[#allocation74_spill] sm:$0xff] %v3548_v15  ;;  %5040 = vst [vmem:[#allocation75_spill] sm:$0xff] %v3552_v63  ;;  %v3568_v56 = vsel %vm2891_vm2, %v2768_v22, %v735_v44  ;;  %1381 = vrot.lane.b32.xlu0 %v3044_v58, %s2530_s11  ;;  %v3572_v63 = vrot.slane %v1633_v34, 1  ;;  %v3574_v15 = vmul.f32 %v2433_v50, %v667_v51  ;;  %v5049_v51 = vld [vmem:[#allocation33_spill] sm:$0xff] }
  0xda   : > { %5041 = vst [vmem:[#allocation76_spill] sm:$0xff] %v3556_v61  ;;  %5042 = vst [vmem:[#allocation77_spill] sm:$0xff] %v3559_v5  ;;  %v2363_v45 = vadd.f32 -0.1, %v1346_v4  ;;  %v3594_v33 = vmul.f32 %v3246_v62, %v3459_v1  ;;  %v3609_v5 = vmul.f32 4.0, %v5049_v51  ;;  %v1751_v58 = vrot.slane %v1346_v4, 7 }
  0xdb   : > { %5043 = vst [vmem:[#allocation78_spill] sm:$0xff] %v3572_v63  ;;  %5044 = vst [vmem:[#allocation79_spill] sm:$0xff] %v3574_v15  ;;  %v720_v61 = vpop.permute.xlu1 %719  ;;  %v718_v44 = vpop.permute.xlu0 %717 }
  0xdc   : > { %5045 = vst [vmem:[#allocation80_spill] sm:$0xff] %v3582_v11  ;;  %v733_v34 = vsel %vm5038_vm14, %v718_v44, %v720_v61  ;;  %v734_v50 = vsel %vm5046_vm13, %v716_v6, %v718_v44  ;;  %5050 = vst [vmem:[#allocation33_spill] sm:$0xff] %v3609_v5  ;;  %v3615_v44 = vmul.f32 %v3246_v62, %v3462_v53  ;;  %v1674_v63 = vmul.f32 1.25, %v2363_v45  ;;  %v5055_v45 = vld [vmem:[#allocation18_spill] sm:$0xff] }
  0xdd   : > { %v3599_v23 = vsel %vm2897_vm3, %v2784_v25, %v734_v50  ;;  %v3604_v42 = vsel %vm2877_vm0, %v2780_v24, %v733_v34  ;;  %1387 = vrot.lane.b32.xlu1 %v3128_v31, %s2530_s11  ;;  %v3619_v50 = vmul.f32 %v3248_v27, %v3459_v1  ;;  %v3623_v34 = vmul.f32 %v3248_v27, %v3462_v53  ;;  %vm5054_vm14 = vmmov %vm5046_vm13  ;;  %v5089_v11 = vld [vmem:[#allocation42_spill] sm:$0xff] }
  0xde   : > { %5047 = vst [vmem:[#allocation81_spill] sm:$0xff] %v3599_v23  ;;  %5048 = vst [vmem:[#allocation82_spill] sm:$0xff] %v3604_v42  ;;  %1385 = vrot.lane.b32.xlu0 %v3073_v32, %s2530_s11  ;;  %v1713_v1 = vrot.slane %v3281_v12, %v2642_v7  ;;  %v1634_v4 = vcombine.high %v3609_v5, %v3609_v5  ;;  %v3667_v32 = vmul.f32 %v3246_v62, %v3515_v21 }
  0xdf   : > { %5051 = vst [vmem:[#allocation83_spill] sm:$0xff] %v3615_v44  ;;  %5052 = vst [vmem:[#allocation84_spill] sm:$0xff] %v3619_v50  ;;  %v724_v6 = vpop.permute.xlu1 %723  ;;  %v722_v46 = vpop.permute.xlu0 %721  ;;  %v1682_v59 = vsub.f32 1.0, %v1674_v63  ;;  %v955_v50 = vstv %s2905_s19  ;;  %s2377_s19 = sshll.u32 %s2591_s0, 9 }
  0xe0   : > { %5053 = vst [vmem:[#allocation85_spill] sm:$0xff] %v3623_v34  ;;  %v731_v53 = vsel %vm5046_vm13, %v722_v46, %v724_v6  ;;  %v732_v31 = vsel %vm5054_vm14, %v720_v61, %v722_v46  ;;  %v1350_v46 = vld [vmem:[%s3527_s14 + $0x8] sm:$0xee]  ;;  %5059 = vst [vmem:[#allocation87_spill] sm:$0xff] %v3667_v32  ;;  %v3671_v61 = vmul.f32 %v3246_v62, %v3518_v36  ;;  %v5069_v34 = vld [vmem:[#allocation19_spill] sm:$0xff]  ;;  %s4673_s7 = scalar_lea.hbm %s4756_s4, %s2377_s19 }
  0xe1   : > { %v3644_v49 = vsel %vm2940_vm4, %v5055_v45, %v732_v31  ;;  %v3649_v52 = vsel %vm2946_vm5, %v5057_v26, %v731_v53  ;;  %1391 = vrot.lane.b32.xlu1 %v2975_v47, %s2530_s11  ;;  %v3675_v31 = vmul.f32 %v3248_v27, %v3515_v21  ;;  %vm5062_vm14 = vmmov %vm5046_vm13  ;;  %v1759_v47 = vsub.f32 %v1350_v46, %v1751_v58  ;;  %v5083_v32 = vld [vmem:[#allocation50_spill] sm:$0xff] }
  0xe2   : > { %5056 = vst [vmem:[#allocation18_spill] sm:$0xff] %v3644_v49  ;;  %5058 = vst [vmem:[#allocation86_spill] sm:$0xff] %v3649_v52  ;;  %1389 = vrot.lane.b32.xlu0 %v3126_v28, %s2530_s11  ;;  %v3708_v58 = vmul.f32 %v3248_v27, %v3538_v16  ;;  %v3718_v43 = vcombine.low %v1709_v41, %v1713_v1  ;;  %s2345_s11 = sshll.u32 %s4384_s6, 5 }
  0xe3   : > { %5060 = vst [vmem:[#allocation88_spill] sm:$0xff] %v3671_v61  ;;  %5061 = vst [vmem:[#allocation89_spill] sm:$0xff] %v3675_v31  ;;  %v728_v51 = vpop.permute.xlu1 %727  ;;  %v726_v60 = vpop.permute.xlu0 %725  ;;  %v1763_v1 = vmax.f32 %v1759_v47, 0.001  ;;  %s4474_s15 = scalar_lea.vmem [#allocation3], %s2345_s11  ;;  %s4645_s18 = scalar_lea.vmem [#allocation5], %s2345_s11 }
  0xe4   : > { %v736_v53 = vsel %vm5046_vm13, %v728_v51, %v3520_v57  ;;  %v729_v5 = vsel %vm5062_vm14, %v726_v60, %v728_v51  ;;  %v730_v28 = vsel %vm5063_vm12, %v724_v6, %v726_v60  ;;  %v671_v51 = vld [vmem:[%s3527_s14] ss:$4 sm:$0xff]  ;;  %v3704_v60 = vmul.f32 %v3246_v62, %v3538_v16  ;;  %s2212_s24 = sshll.u32 %s4474_s15, 4  ;;  %s2226_s8 = sshll.u32 %s4645_s18, 4  ;;  %s4675_s24 = int_to_ptr.vmem [resolvable:$true] %s2212_s24  ;;  %s4710_s8 = int_to_ptr.vmem [resolvable:$true] %s2226_s8 }
  0xe5   : > { %v3688_v21 = vsel %vm2980_vm6, %v5064_v39, %v736_v53  ;;  %v3693_v26 = vsel %vm2986_vm7, %v5066_v38, %v730_v28  ;;  %v3698_v44 = vsel %vm2992_vm8, %v5069_v34, %v729_v5  ;;  %v3712_v6 = vmul.f32 %v3248_v27, %v3518_v36  ;;  %s2434_s16 = scalar_lea.vmem %s4675_s24, 512  ;;  %p2441_p0 = scmp.lt.s32.totalorder %s4675_s24, %s2439_s17 }
  0xe6   : > { %5068 = vst [vmem:[#allocation16_spill] sm:$0xff] %v3693_v26  ;;  %5071 = vst [vmem:[#allocation19_spill] sm:$0xff] %v3698_v44  ;;  %v3714_v28 = vrot.slane %v1634_v4, 1  ;;  %v1678_v5 = vmul.f32 %v1674_v63, %v1674_v63  ;;  %v1686_v57 = vmul.f32 %v1682_v59, %v1682_v59  ;;  %v2364_v62 = vadd.f32 -0.1, %v1347_v29  ;;  %p2435_p11 = scmp.ne.s32.totalorder %s4675_s24, %s2434_s16  ;;  %p2442_p1 = scmp.lt.s32.totalorder %s2440_s10, %s2434_s16 }
  0xe7   : > { %5072 = vst [vmem:[#allocation90_spill] sm:$0xff] %v3712_v6  ;;  %v748_v46 = vpop.permute.xlu1 %747  ;;  %v3716_v53 = vpop.permute.xlu0 %745  ;;  %vm5075_vm12 = vcmp.lt.s32.totalorder %v2843_v30, 127  ;;  %v3727_v27 = vsub.f32 %v671_v51, %v955_v50  ;;  %v1752_v4 = vrot.slane %v1347_v29, 7  ;;  %v1351_v63 = vld [vmem:[%s3527_s14 + $0x10] sm:$0xee]  ;;  %vm5090_vm7 = vnez %v5089_v11 }
  0xe8   : > { %5073 = vst [vmem:[#allocation91_spill] sm:$0xff] %v3714_v28  ;;  %5074 = vst [vmem:[#allocation92_spill] sm:$0xff] %v3716_v53  ;;  %v767_v36 = vsel %vm5075_vm12, %v3716_v53, %v748_v46  ;;  %v3746_v47 = vmul.f32 %v3718_v43, %v1678_v5  ;;  %v1675_v52 = vmul.f32 1.25, %v2364_v62  ;;  %v1345_v44 = vld [vmem:[%s3527_s14] sm:$0x77]  ;;  %v1989_v62 = vcombine.high %v1763_v1, %v1763_v1  ;;  %v5084_v6 = vld [vmem:[#allocation51_spill] sm:$0xff]  ;;  %p2436_p12 = pnand %p2435_p11, %p2608_p5  ;;  %p2443_p2 = por %p2442_p1, %p2441_p0 }
  0xe9   : > { %v3734_v41 = vsel %vm3025_vm10, %v5064_v39, %v767_v36  ;;  %v1690_v36 = vmul.f32 0.36363637, %v1686_v57  ;;  %vm5078_vm13 = vmmov %vm5075_vm12 }
  0xea   : > { %v857_v16 = vsub.f32 %v3734_v41, %v3688_v21  ;;  %5077 = vst [vmem:[#allocation93_spill] sm:$0xff] %v3746_v47  ;;  %vm5079_vm14 = vmmov %vm5075_vm12  ;;  %v5081_v47 = vld [vmem:[#allocation38_spill] sm:$0xff]  ;;  %p2437_p13 = pneg %p2436_p12 }
  0xeb   : > { %v752_v28 = vpop.permute.xlu1 %751  ;;  %v750_v59 = vpop.permute.xlu0 %749  ;;  %vm5082_vm12 = vnez %v5081_v47  ;;  %v1694_v51 = vadd.f32 %v1690_v36, %v1678_v5  ;;  %v1994_v47 = vrot.slane %v1763_v1, 1 }
  0xec   : > { %v865_v26 = vmul.f32 9600.0, %v857_v16  ;;  %v765_v38 = vsel %vm5078_vm13, %v750_v59, %v752_v28  ;;  %v766_v50 = vsel %vm5079_vm14, %v748_v46, %v750_v59  ;;  %v1760_v16 = vsub.f32 %v1351_v63, %v1752_v4  ;;  %vm5086_vm14 = vmmov %vm5078_vm13  ;;  %p2444_p3 = pnand %p2443_p2, %p2437_p13 }
  0xed   : > { %v3759_v57 = vsel %vm3057_vm11, %v2768_v22, %v766_v50  ;;  %v3764_v29 = vsel %vm5082_vm12, %v2784_v25, %v765_v38  ;;  %v1683_v25 = vsub.f32 1.0, %v1675_v52  ;;  %v2362_v38 = vadd.f32 -0.1, %v1345_v44 }
  0xee   : > { %v1029_v53 = vmul.f32 %v865_v26, %v5083_v32  ;;  %v3768_v61 = vmul.f32 %v865_v26, %v5084_v6  ;;  %v858_v46 = vsub.f32 %v3759_v57, %v3568_v56  ;;  %v859_v59 = vsub.f32 %v3764_v29, %v3599_v23  ;;  %v5087_v6 = vld [vmem:[#allocation41_spill] sm:$0xff] }
  0xef   : > { %v3774_v22 = vpop.permute.xlu1 %755  ;;  %v754_v50 = vpop.permute.xlu0 %753  ;;  %vm5088_vm8 = vnez %v5087_v6  ;;  %v3791_v1 = vmax.f32 %v1760_v16, 0.001  ;;  %v1673_v36 = vmul.f32 1.25, %v2362_v38  ;;  %v3817_v11 = vmul.f32 %v3718_v43, %v1694_v51  ;;  %v5102_v43 = vld [vmem:[#allocation64_spill] sm:$0xff] }
  0xf0   : > { %5085 = vst [vmem:[#allocation94_spill] sm:$0xff] %v3774_v22  ;;  %v866_v31 = vmul.f32 9600.0, %v858_v46  ;;  %v867_v63 = vmul.f32 9600.0, %v859_v59  ;;  %v763_v26 = vsel %vm5078_vm13, %v754_v50, %v3774_v22  ;;  %v764_v4 = vsel %vm5086_vm14, %v752_v28, %v754_v50  ;;  %v5092_v46 = vld [vmem:[#allocation53_spill] sm:$0xff] }
  0xf1   : > { %v3784_v32 = vsel %vm5088_vm8, %v2780_v24, %v764_v4  ;;  %v3789_v5 = vsel %vm5090_vm7, %v5055_v45, %v763_v26  ;;  %v5094_v26 = vld [vmem:[#allocation36_spill] sm:$0xff]  ;;  %5096 = vst [vmem:[#allocation97_spill] sm:$0xff] %v3817_v11  ;;  %vm5111_vm13 = vcmp.lt.s32.totalorder %v2843_v30, 32  ;;  %vm5117_vm14 = vcmp.lt.s32.totalorder %v2843_v30, 96 }
  0xf2   : > { %5091 = vst [vmem:[#allocation95_spill] sm:$0xff] %v3789_v5  ;;  %v1030_v59 = vmul.f32 %v866_v31, %v5092_v46  ;;  %v1031_v22 = vmul.f32 %v867_v63, %v3351_v0  ;;  %v3796_v28 = vmul.f32 %v866_v31, %v3355_v10  ;;  %v3799_v50 = vmul.f32 %v867_v63, %v3363_v9  ;;  %vm5121_vm6 = vmmov %vm5111_vm13 }
  0xf3   : > { %v860_v24 = vsub.f32 %v3784_v32, %v3604_v42  ;;  %v861_v45 = vsub.f32 %v3789_v5, %v3644_v49  ;;  %v3805_v16 = vpop.permute.xlu1 %791  ;;  %v3807_v38 = vpop.permute.xlu0 %777  ;;  %v3810_v4 = vmul.f32 4.0, %v5094_v26  ;;  %v1717_v31 = vrot.slane %v3281_v12, %v2671_v14  ;;  %v1349_v49 = vld [vmem:[%s3527_s14] sm:$0xee] }
  0xf4   : > { %5093 = vst [vmem:[#allocation96_spill] sm:$0xff] %v3799_v50  ;;  %v1045_v0 = vcombine.low %v1029_v53, %v1030_v59  ;;  %v1995_v10 = vrot.slane %v1989_v62, 1  ;;  %v1687_v63 = vmul.f32 %v1683_v25, %v1683_v25  ;;  %v1721_v9 = vrot.slane %v3281_v12, %v2668_v13  ;;  %v5097_v50 = vld [vmem:[#allocation49_spill] sm:$0xff]  ;;  %v5100_v25 = vld [vmem:[#allocation62_spill] sm:$0xff] }
  0xf5   : > { %5095 = vst [vmem:[#allocation36_spill] sm:$0xff] %v3810_v4  ;;  %v868_v46 = vmul.f32 9600.0, %v860_v24  ;;  %v869_v6 = vmul.f32 9600.0, %v861_v45  ;;  %v1681_v5 = vsub.f32 1.0, %v1673_v36  ;;  %v5098_v26 = vrot.slane %v3574_v15, %v2635_v3  ;;  %v5104_v45 = vld [vmem:[#allocation65_spill] sm:$0xff] }
  0xf6   : > { %v1055_v42 = vrot.slane %v1045_v0, %v5097_v50  ;;  %v1990_v53 = vcombine.high %v3791_v1, %v3791_v1  ;;  %v1750_v62 = vrot.slane %v1345_v44, 7  ;;  %v1691_v44 = vmul.f32 0.36363637, %v1687_v63 }
  0xf7   : > { %v3824_v23 = vmul.f32 %v1994_v47, %v5098_v26  ;;  %v1032_v59 = vmul.f32 %v868_v46, %v5100_v25  ;;  %v3830_v24 = vmul.f32 %v869_v6, %v3373_v54  ;;  %v3833_v51 = vmul.f32 %v868_v46, %v5102_v43  ;;  %v3838_v11 = vpop.permute.xlu1 %823  ;;  %v3840_v47 = vpop.permute.xlu0 %809 }
  0xf8   : > { %v3836_v0 = vmul.f32 %v869_v6, %v5104_v45  ;;  %v1635_v26 = vcombine.high %v3810_v4, %v3810_v4  ;;  %v1758_v3 = vsub.f32 %v1349_v49, %v1750_v62  ;;  %v5106_v54 = vrot.slane %v3574_v15, %v2642_v7  ;;  %v3851_v45 = vld [vmem:[%s3527_s14 + $0x18] sm:$0x77]  ;;  %v5109_v7 = vld [vmem:[#allocation22_spill] sm:$0xff] }
  0xf9   : > { %5099 = vst [vmem:[#allocation49_spill] sm:$0xff] %v3824_v23  ;;  %5101 = vst [vmem:[#allocation98_spill] sm:$0xff] %v3830_v24  ;;  %v1679_v23 = vmul.f32 %v1675_v52, %v1675_v52  ;;  %v1046_v25 = vcombine.low %v1031_v22, %v1032_v59  ;;  %v1685_v6 = vmul.f32 %v1681_v5, %v1681_v5  ;;  %v1996_v5 = vrot.slane %v3791_v1, 1 }
  0xfa   : > { %5103 = vst [vmem:[#allocation99_spill] sm:$0xff] %v3833_v51  ;;  %5105 = vst [vmem:[#allocation100_spill] sm:$0xff] %v3836_v0  ;;  %v3847_v24 = vmul.f32 %v1995_v10, %v5106_v54  ;;  %v1732_v43 = vcombine.low %v1717_v31, %v1721_v9  ;;  %v1963_v0 = vrot.slane %v3574_v15, %v2671_v14  ;;  %v1997_v62 = vrot.slane %v1990_v53, 1 }
  0xfb   : > { %v1701_v52 = vrot.slane %v3281_v12, %v2632_v2  ;;  %v1705_v49 = vrot.slane %v3281_v12, %v2645_v8  ;;  %v1062_v22 = vrot.slane %v1046_v25, %v5097_v50  ;;  %v782_v63 = vpop.permute.xlu1 %781  ;;  %v780_v10 = vpop.permute.xlu0 %779  ;;  %v1967_v54 = vrot.slane %v3574_v15, %v2668_v13 }
  0xfc   : > { %5107 = vst [vmem:[#allocation101_spill] sm:$0xff] %v3847_v24  ;;  %v3863_v9 = vrot.slane %v1635_v26, 1  ;;  %v1695_v31 = vadd.f32 %v1691_v44, %v1679_v23  ;;  %v1762_v59 = vmax.f32 %v1758_v3, 0.001  ;;  %v2365_v46 = vadd.f32 -0.1, %v3851_v45 }
  0xfd   : > { %v1077_v24 = vcombine.low %v1055_v42, %v1062_v22  ;;  %v1677_v4 = vmul.f32 %v1673_v36, %v1673_v36  ;;  %v1689_v14 = vmul.f32 0.36363637, %v1685_v6  ;;  %v3867_v51 = vmul.f32 4.0, %v5109_v7 }
  0xfe   : > { %5108 = vst [vmem:[#allocation102_spill] sm:$0xff] %v3863_v9  ;;  %v800_v25 = vsel %vm5111_vm13, %v3805_v16, %v3807_v38  ;;  %v3873_v13 = vmul.f32 %v1732_v43, %v1679_v23  ;;  %v1730_v1 = vcombine.low %v1701_v52, %v1705_v49  ;;  %v5113_v53 = vmax.f32 %v3727_v27, 0.001 }
  0xff   : > { %5110 = vst [vmem:[#allocation22_spill] sm:$0xff] %v3867_v51  ;;  %v3881_v42 = vrot.slane %v1077_v24, %v5097_v50  ;;  %v3883_v36 = vpop.permute.xlu1 %785  ;;  %v784_v7 = vpop.permute.xlu0 %783  ;;  %v3885_v26 = vmul.f32 %v1996_v5, %v1963_v0  ;;  %v3887_v44 = vmul.f32 %v1997_v62, %v1967_v54  ;;  %v832_v23 = vsel %vm5117_vm14, %v3838_v11, %v3840_v47 }
 0x100   : > { %5112 = vst [vmem:[#allocation103_spill] sm:$0xff] %v3873_v13  ;;  %v3878_v3 = vmul.f32 %v5113_v53, %v3574_v15  ;;  %v3894_v27 = vmul.f32 %v1732_v43, %v1695_v31  ;;  %v1988_v52 = vcombine.high %v1762_v59, %v1762_v59  ;;  %v1676_v49 = vmul.f32 1.25, %v2365_v46 }
 0x101   : > { %5115 = vst [vmem:[#allocation105_spill] sm:$0xff] %v3885_v26  ;;  %5116 = vst [vmem:[#allocation106_spill] sm:$0xff] %v3887_v44  ;;  %v801_v24 = vsel %vm5111_vm13, %v5064_v39, %v800_v25  ;;  %v1693_v22 = vadd.f32 %v1689_v14, %v1677_v4  ;;  %v1947_v0 = vrot.slane %v3574_v15, %v2632_v2  ;;  %v1992_v62 = vrot.slane %v1762_v59, 1  ;;  %v5149_v35 = vld [vmem:[#allocation99_spill] sm:$0xff] }
 0x102   : > { %5114 = vst [vmem:[#allocation104_spill] sm:$0xff] %v3878_v3  ;;  %5118 = vst [vmem:[#allocation107_spill] sm:$0xff] %v3894_v27  ;;  %v1636_v54 = vcombine.high %v3867_v51, %v3867_v51  ;;  %v3903_v5 = vmul.f32 %v1730_v1, %v1677_v4  ;;  %v1725_v43 = vrot.slane %v3281_v12, %v2689_v18  ;;  %vm5120_vm14 = vcmp.ge.s32.totalorder %v2903_v48, 992 }
 0x103   : > { %v1729_v46 = vrot.slane %v3281_v12, %v2686_v17  ;;  %v790_v31 = vpop.permute.xlu1 %789  ;;  %v3912_v14 = vsel %vm5120_vm14, %v5069_v34, %v832_v23  ;;  %v3914_v39 = vpop.permute.xlu0 %787  ;;  %v1951_v25 = vrot.slane %v3574_v15, %v2645_v8  ;;  %v1753_v59 = vrot.slane %v3851_v45, 7  ;;  %v1352_v23 = vld [vmem:[%s3527_s14 + $0x18] sm:$0xee]  ;;  %vm5122_vm14 = vmmov %vm5121_vm6 }
 0x104   : > { %5119 = vst [vmem:[#allocation108_spill] sm:$0xff] %v3903_v5  ;;  %v798_v53 = vsel %vm5111_vm13, %v780_v10, %v782_v63  ;;  %v3925_v12 = vsel %vm5121_vm6, %v790_v31, %v3805_v16  ;;  %v1993_v6 = vrot.slane %v1988_v52, 1  ;;  %v1684_v3 = vsub.f32 1.0, %v1676_v49  ;;  %vm5126_vm13 = vmmov %vm5121_vm6 }
 0x105   : > { %v799_v44 = vsel %vm5122_vm14, %v3807_v38, %v780_v10  ;;  %v848_v4 = vsub.f32 %v3912_v14, %v3925_v12  ;;  %v3933_v5 = vmul.f32 %v1730_v1, %v1693_v22  ;;  %v3935_v45 = vrot.slane %v1636_v54, 1 }
 0x106   : > { %v3937_v51 = vmul.f32 %v1992_v62, %v1947_v0  ;;  %v3939_v26 = vmul.f32 %v1676_v49, %v1676_v49  ;;  %v3941_v16 = vcombine.low %v1725_v43, %v1729_v46  ;;  %v3948_v38 = vsel %vm5121_vm6, %v784_v7, %v3883_v36 }
 0x107   : > { %5123 = vst [vmem:[#allocation109_spill] sm:$0xff] %v3933_v5  ;;  %5124 = vst [vmem:[#allocation110_spill] sm:$0xff] %v3935_v45  ;;  %v797_v10 = vsel %vm5126_vm13, %v782_v63, %v784_v7  ;;  %v856_v1 = vmul.f32 9600.0, %v848_v4  ;;  %v814_v22 = vpop.permute.xlu1 %813  ;;  %v812_v54 = vpop.permute.xlu0 %811  ;;  %v1761_v0 = vsub.f32 %v1352_v23, %v1753_v59  ;;  %vm5127_vm14 = vcmp.lt.s32.totalorder %v2843_v30, 96  ;;  %v5137_v5 = vld [vmem:[#allocation48_spill] sm:$0xff] }
 0x108   : > { %5125 = vst [vmem:[#allocation111_spill] sm:$0xff] %v3937_v51  ;;  %v830_v49 = vsel %vm5127_vm14, %v812_v54, %v814_v22  ;;  %vm5128_vm5 = vmmov %vm5127_vm14  ;;  %v3957_v43 = vmul.f32 %v1993_v6, %v1951_v25  ;;  %v3959_v46 = vmul.f32 %v1684_v3, %v1684_v3  ;;  %v3969_v51 = vmul.f32 %v3941_v16, %v3939_v26 }
 0x109   : > { %v831_v62 = vsel %vm5128_vm5, %v3840_v47, %v812_v54  ;;  %v3962_v52 = vmul.f32 %v856_v1, %v3704_v60  ;;  %v3965_v63 = vmul.f32 %v856_v1, %v3708_v58  ;;  %v842_v4 = vsub.f32 %v830_v49, %v799_v44  ;;  %vm5131_vm5 = vmmov %vm5121_vm6 }
 0x10a   : > { %5129 = vst [vmem:[#allocation112_spill] sm:$0xff] %v3957_v43  ;;  %v841_v7 = vsub.f32 %v831_v62, %v801_v24  ;;  %v873_v59 = vadd.f32 %v831_v62, %v801_v24  ;;  %v874_v23 = vadd.f32 %v830_v49, %v799_v44  ;;  %5130 = vst [vmem:[#allocation113_spill] sm:$0xff] %v3969_v51  ;;  %v3978_v43 = vmax.f32 %v1761_v0, 0.001 }
 0x10b   : > { %v3976_v3 = vsel %vm5131_vm5, %v3914_v39, %v790_v31  ;;  %v850_v25 = vmul.f32 9600.0, %v842_v4  ;;  %v818_v1 = vpop.permute.xlu1 %817  ;;  %v816_v54 = vpop.permute.xlu0 %815  ;;  %vm5133_vm6 = vmmov %vm5127_vm14 }
 0x10c   : > { %v849_v6 = vmul.f32 9600.0, %v841_v7  ;;  %5132 = vst [vmem:[#allocation114_spill] sm:$0xff] %v3978_v43  ;;  %v881_v44 = vadd.f32 %v873_v59, %v3734_v41  ;;  %v882_v24 = vadd.f32 %v874_v23, %v3759_v57  ;;  %v828_v49 = vsel %vm5133_vm6, %v816_v54, %v818_v1  ;;  %vm5134_vm13 = vmmov %vm5133_vm6 }
 0x10d   : > { %v829_v62 = vsel %vm5134_vm13, %v814_v22, %v816_v54  ;;  %v963_v31 = vmul.f32 %v850_v25, %v3531_v55  ;;  %v1158_v4 = vmul.f32 %v850_v25, %v3563_v37  ;;  %v844_v57 = vsub.f32 %v828_v49, %v797_v10  ;;  %vm5140_vm14 = vmmov %vm5133_vm6 }
 0x10e   : > { %v962_v47 = vmul.f32 %v849_v6, %v3497_v20  ;;  %v1157_v7 = vmul.f32 %v849_v6, %v3509_v40  ;;  %v889_v0 = vadd.f32 %v881_v44, %v3688_v21  ;;  %v890_v41 = vadd.f32 %v882_v24, %v3568_v56  ;;  %vm5153_vm13 = vmmov %vm5133_vm6 }
 0x10f   : > { %v843_v59 = vsub.f32 %v829_v62, %v798_v53  ;;  %v3996_v22 = vadd.f32 %v3796_v28, %v1158_v4  ;;  %v875_v54 = vadd.f32 %v829_v62, %v798_v53  ;;  %v822_v51 = vpop.permute.xlu1 %821  ;;  %v820_v45 = vpop.permute.xlu0 %819  ;;  %v5138_v6 = vrot.slane %v5137_v5, %v2632_v2 }
 0x110   : > { %v978_v23 = vcombine.low %v962_v47, %v963_v31  ;;  %v3993_v15 = vadd.f32 %v3768_v61, %v1157_v7  ;;  %v5139_v21 = vrot.slane %v5137_v5, %v2645_v8  ;;  %v852_v24 = vmul.f32 9600.0, %v844_v57  ;;  %v5142_v57 = vld [vmem:[#allocation80_spill] sm:$0xff] }
 0x111   : > { %5136 = vst [vmem:[#allocation116_spill] sm:$0xff] %v3996_v22  ;;  %v939_v25 = vsub.f32 %v889_v0, %v5138_v6  ;;  %v851_v44 = vmul.f32 9600.0, %v843_v59  ;;  %v876_v61 = vadd.f32 %v828_v49, %v797_v10  ;;  %v883_v31 = vadd.f32 %v875_v54, %v3764_v29  ;;  %v5143_v10 = vld [vmem:[#allocation84_spill] sm:$0xff]  ;;  %v5158_v22 = vld [vmem:[#allocation95_spill] sm:$0xff] }
 0x112   : > { %5135 = vst [vmem:[#allocation115_spill] sm:$0xff] %v3993_v15  ;;  %v940_v56 = vsub.f32 %v890_v41, %v5139_v21  ;;  %v988_v47 = vrot.slane %v978_v23, %v5097_v50  ;;  %v4009_v28 = vsel %vm5140_vm14, %v822_v51, %v3838_v11  ;;  %v965_v4 = vmul.f32 %v852_v24, %v3594_v33  ;;  %v5141_v41 = vld [vmem:[#allocation81_spill] sm:$0xff] }
 0x113   : > { %v947_v53 = vmul.f32 0.00192, %v939_v25  ;;  %v964_v7 = vmul.f32 %v851_v44, %v3535_v19  ;;  %v884_v0 = vadd.f32 %v876_v61, %v3784_v32  ;;  %v891_v59 = vadd.f32 %v883_v31, %v5141_v41  ;;  %v760_v29 = vpop.permute.xlu1 %759  ;;  %v758_v54 = vpop.permute.xlu0 %757  ;;  %v5145_v61 = vld [vmem:[#allocation9_spill] sm:$0xff]  ;;  %v5147_v41 = vld [vmem:[#allocation96_spill] sm:$0xff] }
 0x114   : > { %v948_v62 = vmul.f32 0.00192, %v940_v56  ;;  %v1159_v23 = vmul.f32 %v851_v44, %v5142_v57  ;;  %v1160_v49 = vmul.f32 %v852_v24, %v5143_v10  ;;  %v795_v11 = vsel %vm5131_vm5, %v3883_v36, %v3914_v39  ;;  %v5144_v56 = vld [vmem:[#allocation82_spill] sm:$0xff] }
 0x115   : > { %v979_v25 = vcombine.low %v964_v7, %v965_v4  ;;  %v847_v21 = vsub.f32 %v4009_v28, %v3976_v3  ;;  %v892_v32 = vadd.f32 %v884_v0, %v5144_v56  ;;  %v5146_v31 = vrot.slane %v5137_v5, %v5145_v61 }
 0x116   : > { %v1104_v6 = vcombine.low %v947_v53, %v948_v62  ;;  %v4028_v24 = vadd.f32 %v5147_v41, %v1159_v23  ;;  %v4031_v13 = vadd.f32 %v5149_v35, %v1160_v49  ;;  %v826_v53 = vsel %vm5133_vm6, %v820_v45, %v822_v51  ;;  %v5151_v62 = vld [vmem:[#allocation10_spill] sm:$0xff] }
 0x117   : > { %v941_v44 = vsub.f32 %v891_v59, %v5146_v31  ;;  %v995_v36 = vrot.slane %v979_v25, %v5097_v50  ;;  %v855_v39 = vmul.f32 9600.0, %v847_v21  ;;  %v5152_v7 = vrot.slane %v5137_v5, %v5151_v62  ;;  %v4042_v56 = vpop.permute.xlu1 %1487  ;;  %v4044_v35 = vpop.permute.xlu0 %1473  ;;  %v5155_v21 = vld [vmem:[#allocation90_spill] sm:$0xff] }
 0x118   : > { %5148 = vst [vmem:[#allocation48_spill] sm:$0xff] %v4028_v24  ;;  %5150 = vst [vmem:[#allocation81_spill] sm:$0xff] %v4031_v13  ;;  %v1114_v27 = vrot.slane %v1104_v6, %v5097_v50  ;;  %v827_v59 = vsel %vm5153_vm13, %v818_v1, %v820_v45  ;;  %v846_v23 = vsub.f32 %v826_v53, %v795_v11  ;;  %v5154_v6 = vld [vmem:[#allocation88_spill] sm:$0xff]  ;;  %vm5157_vm14 = vcmp.lt.s32.totalorder %v2843_v30, 127  ;;  %v5159_v13 = vld [vmem:[#allocation87_spill] sm:$0xff] }
 0x119   : > { %v942_v4 = vsub.f32 %v892_v32, %v5152_v7  ;;  %v949_v0 = vmul.f32 0.00192, %v941_v44  ;;  %v1010_v49 = vcombine.low %v988_v47, %v995_v36  ;;  %v968_v25 = vmul.f32 %v855_v39, %v5154_v6  ;;  %v5156_v36 = vld [vmem:[#allocation92_spill] sm:$0xff]  ;;  %vm5167_vm5 = vmmov %vm5157_vm14 }
 0x11a   : > { %v4048_v31 = vmul.f32 %v855_v39, %v5155_v21  ;;  %v845_v51 = vsub.f32 %v827_v59, %v3948_v38  ;;  %v880_v32 = vadd.f32 %v3912_v14, %v3925_v12  ;;  %v854_v41 = vmul.f32 9600.0, %v846_v23  ;;  %v5160_v14 = vld [vmem:[#allocation89_spill] sm:$0xff]  ;;  %v5161_v23 = vld [vmem:[#allocation83_spill] sm:$0xff]  ;;  %vm5169_vm6 = vmmov %vm5167_vm5 }
 0x11b   : > { %v950_v44 = vmul.f32 0.00192, %v942_v4  ;;  %v877_v45 = vadd.f32 %v827_v59, %v3948_v38  ;;  %v4055_v1 = vrot.slane %v1010_v49, %v5097_v50  ;;  %v981_v7 = vcombine.low %v968_v25, %v3962_v52  ;;  %v4064_v4 = vpop.permute.xlu1 %1535  ;;  %v4066_v38 = vpop.permute.xlu0 %1521  ;;  %v5162_v49 = vld [vmem:[#allocation85_spill] sm:$0xff] }
 0x11c   : > { %v853_v47 = vmul.f32 9600.0, %v845_v51  ;;  %v768_v39 = vsel %vm5157_vm14, %v760_v29, %v5156_v36  ;;  %v967_v24 = vmul.f32 %v854_v41, %v5159_v13  ;;  %v1162_v12 = vmul.f32 %v854_v41, %v5160_v14  ;;  %v5165_v36 = vld [vmem:[#allocation19_spill] sm:$0xff]  ;;  %v5166_v14 = vld [vmem:[#allocation100_spill] sm:$0xff] }
 0x11d   : > { %v1105_v9 = vcombine.low %v949_v0, %v950_v44  ;;  %v885_v15 = vadd.f32 %v877_v45, %v5158_v22  ;;  %v1009_v59 = vrot.slane %v981_v7, %v5097_v50  ;;  %v776_v0 = vsel %vm3136_vm15, %v5069_v34, %v768_v39  ;;  %v5164_v44 = vld [vmem:[#allocation18_spill] sm:$0xff] }
 0x11e   : > { %v966_v52 = vmul.f32 %v853_v47, %v5161_v23  ;;  %v1161_v25 = vmul.f32 %v853_v47, %v5162_v49  ;;  %v864_v41 = vsub.f32 %v776_v0, %v5165_v36  ;;  %v888_v62 = vadd.f32 %v880_v32, %v776_v0  ;;  %v5168_v23 = vld [vmem:[#allocation94_spill] sm:$0xff] }
 0x11f   : > { %v1121_v22 = vrot.slane %v1105_v9, %v5097_v50  ;;  %v893_v45 = vadd.f32 %v885_v15, %v5164_v44  ;;  %v761_v7 = vsel %vm5167_vm5, %v758_v54, %v760_v29  ;;  %v762_v47 = vsel %vm5169_vm6, %v5168_v23, %v758_v54  ;;  %v4086_v39 = vpop.permute.xlu1 %1477  ;;  %v4088_v15 = vpop.permute.xlu0 %1475  ;;  %v5175_v23 = vld [vmem:[#allocation66_spill] sm:$0xff] }
 0x120   : > { %v980_v61 = vcombine.low %v966_v52, %v967_v24  ;;  %v4078_v13 = vadd.f32 %v5166_v14, %v1161_v25  ;;  %v872_v34 = vmul.f32 9600.0, %v864_v41  ;;  %v896_v9 = vadd.f32 %v888_v62, %v5165_v36  ;;  %v5170_v14 = vld [vmem:[#allocation17_spill] sm:$0xff]  ;;  %v5172_v25 = vld [vmem:[#allocation20_spill] sm:$0xff]  ;;  %v5176_v36 = vld [vmem:[#allocation67_spill] sm:$0xff] }
 0x121   : > { %v1136_v51 = vcombine.low %v1114_v27, %v1121_v22  ;;  %v1692_v24 = vmul.f32 0.36363637, %v3959_v46  ;;  %v774_v29 = vsel %vm3155_vm9, %v5170_v14, %v762_v47  ;;  %v775_v54 = vsel %vm3142_vm1, %v5172_v25, %v761_v7  ;;  %v5177_v47 = vld [vmem:[#allocation86_spill] sm:$0xff]  ;;  %v5178_v7 = vld [vmem:[#allocation16_spill] sm:$0xff] }
 0x122   : > { %v1002_v32 = vrot.slane %v980_v61, %v5097_v50  ;;  %vm5174_vm13 = vcmp.lt.s32.totalorder %v2843_v30, 32  ;;  %v879_v46 = vadd.f32 %v4009_v28, %v3976_v3  ;;  %v878_v61 = vadd.f32 %v826_v53, %v795_v11 }
 0x123   : > { %v1496_v27 = vsel %vm5174_vm13, %v4042_v56, %v4044_v35  ;;  %v4103_v62 = vrot.slane %v1136_v51, %v5097_v50  ;;  %v1036_v22 = vmul.f32 %v872_v34, %v5175_v23  ;;  %v1172_v41 = vmul.f32 %v872_v34, %v5176_v36  ;;  %v4118_v28 = vpop.permute.xlu1 %1481  ;;  %v4120_v11 = vpop.permute.xlu0 %1479  ;;  %vm5184_vm5 = vmmov %vm5174_vm13  ;;  %v5187_v36 = vld [vmem:[#allocation71_spill] sm:$0xff] }
 0x124   : > { %v1011_v44 = vcombine.low %v1002_v32, %v1009_v59  ;;  %v862_v14 = vsub.f32 %v774_v29, %v5177_v47  ;;  %v863_v25 = vsub.f32 %v775_v54, %v5178_v7  ;;  %v5179_v52 = vrot.slane %v5137_v5, %v2686_v17  ;;  %vm5193_vm6 = vmmov %vm5184_vm5 }
 0x125   : > { %v886_v49 = vadd.f32 %v878_v61, %v774_v29  ;;  %v887_v51 = vadd.f32 %v879_v46, %v775_v54  ;;  %vm5180_vm14 = vcmp.lt.s32.totalorder %v2843_v30, 96  ;;  %v4126_v59 = vadd.f32 %v1172_v41, %v3965_v63  ;;  %v5185_v63 = vld [vmem:[#allocation70_spill] sm:$0xff] }
 0x126   : > { %v946_v0 = vsub.f32 %v896_v9, %v5179_v52  ;;  %v1544_v3 = vsel %vm5180_vm14, %v4064_v4, %v4066_v38  ;;  %v4123_v53 = vrot.slane %v1011_v44, %v5097_v50  ;;  %v870_v34 = vmul.f32 9600.0, %v862_v14  ;;  %v5182_v9 = vld [vmem:[#allocation13_spill] sm:$0xff]  ;;  %v5186_v14 = vld [vmem:[#allocation68_spill] sm:$0xff]  ;;  %v5192_v44 = vld [vmem:[#allocation98_spill] sm:$0xff] }
 0x127   : > { %5181 = vst [vmem:[#allocation80_spill] sm:$0xff] %v4126_v59  ;;  %v871_v32 = vmul.f32 9600.0, %v863_v25  ;;  %v5183_v52 = vrot.slane %v5137_v5, %v5182_v9  ;;  %v894_v54 = vadd.f32 %v886_v49, %v5177_v47  ;;  %v895_v46 = vadd.f32 %v887_v51, %v5178_v7  ;;  %v1486_v21 = vpop.permute.xlu1 %1485  ;;  %v4149_v6 = vpop.permute.xlu0 %1483  ;;  %vm5197_vm14 = vmmov %vm5184_vm5 }
 0x128   : > { %v1495_v61 = vsel %vm5184_vm5, %v4044_v35, %v4088_v15  ;;  %v1034_v41 = vmul.f32 %v870_v34, %v5185_v63  ;;  %v1170_v23 = vmul.f32 %v870_v34, %v5187_v36  ;;  %v954_v8 = vmul.f32 0.00192, %v946_v0 }
 0x129   : > { %v943_v29 = vsub.f32 %v893_v45, %v5183_v52  ;;  %v1035_v25 = vmul.f32 %v871_v32, %v5186_v14  ;;  %v5188_v45 = vld [vmem:[#allocation12_spill] sm:$0xff]  ;;  %v5190_v7 = vrot.slane %v5137_v5, %v2689_v18  ;;  %v5191_v52 = vld [vmem:[#allocation69_spill] sm:$0xff]  ;;  %vm5195_vm13 = vcmp.ge.s32.totalorder %v2903_v48, 992 }
 0x12a   : > { %v5189_v49 = vrot.slane %v5137_v5, %v5188_v45  ;;  %v1171_v35 = vmul.f32 %v871_v32, %v5191_v52  ;;  %v1047_v63 = vcombine.low %v5192_v44, %v1034_v41  ;;  %v4152_v14 = vadd.f32 %v1170_v23, %v1162_v12 }
 0x12b   : > { %v945_v51 = vsub.f32 %v895_v46, %v5190_v7  ;;  %v1048_v59 = vcombine.low %v1035_v25, %v1036_v22  ;;  %v951_v34 = vmul.f32 0.00192, %v943_v29  ;;  %v1489_v46 = vsel %vm5193_vm6, %v1486_v21, %v4042_v56  ;;  %v5194_v22 = vld [vmem:[#allocation27_spill] sm:$0xff]  ;;  %v1526_v25 = vpop.permute.xlu1 %1525 }
 0x12c   : > { %v944_v47 = vsub.f32 %v894_v54, %v5189_v49  ;;  %v4157_v49 = vadd.f32 %v1171_v35, %v4048_v31  ;;  %v1069_v5 = vrot.slane %v1047_v63, %v5097_v50  ;;  %v1568_v12 = vsel %vm5195_vm13, %v5194_v22, %v1544_v3  ;;  %vm5203_vm13 = vmmov %vm5197_vm14 }
 0x12d   : > { %v953_v54 = vmul.f32 0.00192, %v945_v51  ;;  %v1076_v32 = vrot.slane %v1048_v59, %v5097_v50  ;;  %v1576_v29 = vsub.f32 %v1568_v12, %v1489_v46  ;;  %v4167_v41 = vadd.f32 %v1568_v12, %v1489_v46  ;;  %v1524_v59 = vpop.permute.xlu0 %1523 }
 0x12e   : > { %v952_v36 = vmul.f32 0.00192, %v944_v47  ;;  %v5196_v47 = vld [vmem:[#allocation28_spill] sm:$0xff]  ;;  %v1696_v7 = vadd.f32 %v1692_v24, %v3939_v26  ;;  %vm5198_vm5 = vcmp.lt.s32.totalorder %v2843_v30, 96  ;;  %v5200_v24 = vrot.slane %v3704_v60, %v2632_v2 }
 0x12f   : > { %v1107_v44 = vcombine.low %v953_v54, %v954_v8  ;;  %v1078_v31 = vcombine.low %v1069_v5, %v1076_v32  ;;  %v1513_v63 = vsel %vm5197_vm14, %v5196_v47, %v1496_v27  ;;  %v1542_v8 = vsel %vm5198_vm5, %v1524_v59, %v1526_v25  ;;  %vm5199_vm6 = vmmov %vm5198_vm5  ;;  %v1530_v12 = vpop.permute.xlu1 %1529  ;;  %v5221_v0 = vld [vmem:[#allocation80_spill] sm:$0xff] }
 0x130   : > { %v1106_v23 = vcombine.low %v951_v34, %v952_v36  ;;  %v1584_v36 = vmul.f32 9600.0, %v1576_v29  ;;  %v1543_v27 = vsel %vm5199_vm6, %v4066_v38, %v1524_v59  ;;  %v1570_v35 = vsub.f32 %v1542_v8, %v1495_v61  ;;  %vm5204_vm14 = vmmov %vm5203_vm13 }
 0x131   : > { %v1135_v48 = vrot.slane %v1107_v44, %v5097_v50  ;;  %v4179_v3 = vrot.slane %v1078_v31, %v5097_v50  ;;  %v4184_v34 = vadd.f32 %v1542_v8, %v1495_v61  ;;  %v5201_v5 = vrot.slane %v3708_v58, %v2632_v2  ;;  %v1528_v60 = vpop.permute.xlu0 %1527  ;;  %vm5207_vm6 = vmmov %vm5198_vm5 }
 0x132   : > { %v1128_v51 = vrot.slane %v1106_v23, %v5097_v50  ;;  %v1805_v54 = vmul.f32 %v5200_v24, %v1584_v36  ;;  %v1569_v46 = vsub.f32 %v1543_v27, %v1513_v63  ;;  %v1494_v38 = vsel %vm5203_vm13, %v4088_v15, %v4086_v39 }
 0x133   : > { %v4192_v32 = vmul.f32 %v5201_v5, %v1584_v36  ;;  %v1578_v61 = vmul.f32 9600.0, %v1570_v35  ;;  %v4200_v44 = vadd.f32 %v1543_v27, %v1513_v63  ;;  %v1493_v58 = vsel %vm5204_vm14, %v4086_v39, %v4120_v11  ;;  %v5211_v5 = vld [vmem:[#allocation52_spill] sm:$0xff]  ;;  %vm5215_vm14 = vmmov %vm5203_vm13 }
 0x134   : > { %v1137_v26 = vcombine.low %v1128_v51, %v1135_v48  ;;  %v1577_v31 = vmul.f32 9600.0, %v1569_v46  ;;  %v1540_v59 = vsel %vm5198_vm5, %v1528_v60, %v1530_v12  ;;  %v5205_v51 = vrot.slane %v3531_v55, %v2632_v2 }
 0x135   : > { %5202 = vst [vmem:[#allocation84_spill] sm:$0xff] %v4192_v32  ;;  %v5206_v15 = vrot.slane %v3563_v37, %v2632_v2  ;;  %v1541_v36 = vsel %vm5207_vm6, %v1526_v25, %v1528_v60  ;;  %v1572_v8 = vsub.f32 %v1540_v59, %v1493_v58  ;;  %v5208_v39 = vrot.slane %v3497_v20, %v2632_v2  ;;  %v1534_v37 = vpop.permute.xlu1 %1533  ;;  %v5214_v60 = vld [vmem:[#allocation54_spill] sm:$0xff]  ;;  %vm5218_vm6 = vmmov %vm5203_vm13 }
 0x136   : > { %v1151_v29 = vrot.slane %v1137_v26, %v5097_v50  ;;  %v1799_v48 = vmul.f32 %v5205_v51, %v1578_v61  ;;  %v5209_v55 = vrot.slane %v3509_v40, %v2632_v2  ;;  %v1571_v24 = vsub.f32 %v1541_v36, %v1494_v38 }
 0x137   : > { %v4215_v63 = vmul.f32 %v5206_v15, %v1578_v61  ;;  %v1798_v35 = vmul.f32 %v5208_v39, %v1577_v31  ;;  %v5212_v46 = vcombine.low %v4055_v1, %v4123_v53  ;;  %v1580_v20 = vmul.f32 9600.0, %v1572_v8  ;;  %v1532_v61 = vpop.permute.xlu0 %1531 }
 0x138   : > { %v4220_v27 = vcombine.low %v4103_v62, %v1151_v29  ;;  %v4228_v26 = vmul.f32 %v5209_v55, %v1577_v31  ;;  %v4240_v62 = vsel %vm5203_vm13, %v4120_v11, %v4118_v28  ;;  %v4243_v40 = vmul.f32 %v3941_v16, %v1696_v7  ;;  %vm5229_vm13 = vmmov %vm5198_vm5 }
 0x139   : > { %v4234_v25 = vadd.f32 %v5212_v46, %v5211_v5  ;;  %v1490_v1 = vsel %vm5215_vm14, %v4149_v6, %v1486_v21  ;;  %v1579_v53 = vmul.f32 9600.0, %v1571_v24  ;;  %v1537_v31 = vsel %vm5198_vm5, %v1534_v37, %v4064_v4  ;;  %v1428_v55 = vpop.permute.xlu1 %1427  ;;  %vm5236_vm14 = vmmov %vm5198_vm5 }
 0x13a   : > { %5210 = vst [vmem:[#allocation82_spill] sm:$0xff] %v4228_v26  ;;  %5213 = vst [vmem:[#allocation96_spill] sm:$0xff] %v4243_v40  ;;  %v4247_v29 = vmul.f32 %v4220_v27, %v5214_v60  ;;  %v5216_v11 = vrot.slane %v3594_v33, %v2632_v2  ;;  %v5217_v16 = vrot.slane %v5143_v10, %v2632_v2  ;;  %vm5239_vm5 = vcmp.lt.s32.totalorder %v2843_v30, 127  ;;  %v5250_v40 = vld [vmem:[#allocation85_spill] sm:$0xff] }
 0x13b   : > { %v1575_v15 = vsub.f32 %v1537_v31, %v1490_v1  ;;  %v4263_v8 = vadd.f32 %v1537_v31, %v1490_v1  ;;  %v1491_v10 = vsel %vm5218_vm6, %v4118_v28, %v4149_v6  ;;  %v5219_v24 = vrot.slane %v3535_v19, %v2632_v2  ;;  %v1426_v31 = vpop.permute.xlu0 %1425  ;;  %v5224_v28 = vld [vmem:[#allocation88_spill] sm:$0xff]  ;;  %vm5240_vm6 = vmmov %vm5239_vm5 }
 0x13c   : > { %v1801_v51 = vmul.f32 %v5216_v11, %v1580_v20  ;;  %v4261_v7 = vmul.f32 %v5217_v16, %v1580_v20  ;;  %v1202_v21 = vrot.slane %v4247_v29, %v5182_v9  ;;  %v1206_v39 = vrot.slane %v4247_v29, %v5188_v45 }
 0x13d   : > { %v1210_v4 = vrot.slane %v4247_v29, %v2689_v18  ;;  %v1214_v33 = vrot.slane %v4247_v29, %v2686_v17  ;;  %v1800_v46 = vmul.f32 %v5219_v24, %v1579_v53  ;;  %v5220_v20 = vrot.slane %v5142_v57, %v2632_v2  ;;  %v5226_v24 = vld [vmem:[#allocation90_spill] sm:$0xff] }
 0x13e   : > { %v1583_v1 = vmul.f32 9600.0, %v1575_v15  ;;  %v1227_v11 = vadd.f32 %v1202_v21, %v4078_v13  ;;  %v1228_v16 = vadd.f32 %v1206_v39, %v4152_v14  ;;  %v5222_v6 = vrot.slane %v5211_v5, %v2686_v17  ;;  %v5230_v14 = vld [vmem:[#allocation55_spill] sm:$0xff]  ;;  %v5232_v39 = vld [vmem:[#allocation57_spill] sm:$0xff] }
 0x13f   : > { %v4283_v60 = vmul.f32 %v5220_v20, %v1579_v53  ;;  %v1229_v56 = vadd.f32 %v1210_v4, %v4157_v49  ;;  %v1230_v23 = vadd.f32 %v1214_v33, %v5221_v0  ;;  %v5225_v57 = vrot.slane %v5224_v28, %v2632_v2  ;;  %v5231_v0 = vld [vmem:[#allocation56_spill] sm:$0xff]  ;;  %v5234_v28 = vld [vmem:[#allocation11_spill] sm:$0xff] }
 0x140   : > { %v4292_v19 = vadd.f32 %v5222_v6, %v1805_v54  ;;  %v5227_v15 = vrot.slane %v5226_v24, %v2632_v2  ;;  %v1538_v13 = vsel %vm5229_vm13, %v1532_v61, %v1534_v37  ;;  %v1276_v49 = vadd.f32 %v5230_v14, %v1227_v11  ;;  %v5233_v54 = vld [vmem:[#allocation58_spill] sm:$0xff]  ;;  %v1432_v6 = vpop.permute.xlu1 %1431  ;;  %vm5260_vm13 = vmmov %vm5239_vm5 }
 0x141   : > { %v1804_v53 = vmul.f32 %v5225_v57, %v1583_v1  ;;  %v1277_v21 = vadd.f32 %v5231_v0, %v1228_v16  ;;  %v1278_v4 = vadd.f32 %v5232_v39, %v1229_v56  ;;  %v1279_v33 = vadd.f32 %v5233_v54, %v1230_v23  ;;  %v5248_v39 = vld [vmem:[#allocation83_spill] sm:$0xff] }
 0x142   : > { %5223 = vst [vmem:[#allocation99_spill] sm:$0xff] %v4292_v19  ;;  %v4300_v20 = vmul.f32 %v5227_v15, %v1583_v1  ;;  %v5235_v57 = vrot.slane %v5211_v5, %v5234_v28  ;;  %v4313_v24 = vadd.f32 %v1541_v36, %v1494_v38  ;;  %v1539_v1 = vsel %vm5236_vm14, %v1530_v12, %v1532_v61  ;;  %v1430_v15 = vpop.permute.xlu0 %1429  ;;  %vm5263_vm14 = vmmov %vm5239_vm5  ;;  %v5282_v0 = vld [vmem:[#allocation115_spill] sm:$0xff] }
 0x143   : > { %v1574_v37 = vsub.f32 %v1538_v13, %v1491_v10  ;;  %v1290_v11 = vcombine.low %v1276_v49, %v1277_v21  ;;  %v1291_v32 = vcombine.low %v1278_v4, %v1279_v33  ;;  %v4317_v16 = vadd.f32 %v1540_v59, %v1493_v58 }
 0x144   : > { %5228 = vst [vmem:[#allocation92_spill] sm:$0xff] %v4300_v20  ;;  %v4311_v17 = vadd.f32 %v5235_v57, %v1799_v48  ;;  %v1573_v56 = vsub.f32 %v1539_v1, %v4240_v62  ;;  %v5237_v23 = vrot.slane %v5211_v5, %v2632_v2  ;;  %v1447_v38 = vsel %vm5239_vm5, %v1426_v31, %v1428_v55  ;;  %v1436_v21 = vpop.permute.xlu1 %1435  ;;  %v5244_v57 = vld [vmem:[#allocation89_spill] sm:$0xff] }
 0x145   : > { %v1582_v48 = vmul.f32 9600.0, %v1574_v37  ;;  %v1446_v12 = vsel %vm5240_vm6, %v1428_v55, %v1430_v15  ;;  %v1312_v36 = vrot.slane %v1290_v11, %v5097_v50  ;;  %v1319_v61 = vrot.slane %v1291_v32, %v5097_v50  ;;  %v5246_v32 = vld [vmem:[#allocation35_spill] sm:$0xff] }
 0x146   : > { %v4323_v54 = vadd.f32 %v5237_v23, %v1798_v35  ;;  %v1581_v58 = vmul.f32 9600.0, %v1573_v56  ;;  %v4334_v49 = vsel %vm3025_vm10, %v5196_v47, %v1447_v38  ;;  %v5242_v35 = vld [vmem:[#allocation87_spill] sm:$0xff]  ;;  %v5245_v37 = vrot.slane %v5244_v57, %v2632_v2  ;;  %v1434_v38 = vpop.permute.xlu0 %1433  ;;  %vm5252_vm10 = vmmov %vm5239_vm5 }
 0x147   : > { %v5243_v4 = vrot.slane %v5242_v35, %v2632_v2  ;;  %v4346_v55 = vadd.f32 %v4200_v44, %v4334_v49  ;;  %v1466_v56 = vsel %vm3057_vm11, %v5246_v32, %v1446_v12  ;;  %v1321_v59 = vcombine.low %v1312_v36, %v1319_v61  ;;  %v5255_v12 = vld [vmem:[#allocation10_spill] sm:$0xff]  ;;  %vm5257_vm11 = vmmov %vm5239_vm5 }
 0x148   : > { %5238 = vst [vmem:[#allocation95_spill] sm:$0xff] %v4323_v54  ;;  %v4342_v23 = vmul.f32 %v5245_v37, %v1582_v48  ;;  %v5249_v35 = vrot.slane %v5248_v39, %v2632_v2  ;;  %v5251_v57 = vrot.slane %v5250_v40, %v2632_v2  ;;  %v1445_v44 = vsel %vm5252_vm10, %v1430_v15, %v1432_v6  ;;  %v5253_v37 = vld [vmem:[#allocation9_spill] sm:$0xff] }
 0x149   : > { %v1803_v33 = vmul.f32 %v5243_v4, %v1582_v48  ;;  %v5254_v20 = vrot.slane %v5211_v5, %v5253_v37  ;;  %v5256_v36 = vrot.slane %v5211_v5, %v5255_v12  ;;  %v1610_v39 = vadd.f32 %v4184_v34, %v1466_v56 }
 0x14a   : > { %v1802_v4 = vmul.f32 %v5249_v35, %v1581_v58  ;;  %v4357_v48 = vmul.f32 %v5251_v57, %v1581_v58  ;;  %v1443_v40 = vsel %vm5257_vm11, %v1434_v38, %v1436_v21  ;;  %v5258_v58 = vrot.slane %v5211_v5, %v2689_v18 }
 0x14b   : > { %v4364_v11 = vadd.f32 %v5254_v20, %v1800_v46  ;;  %v4369_v61 = vadd.f32 %v5256_v36, %v1801_v51  ;;  %v1606_v15 = vadd.f32 %v1538_v13, %v1491_v10  ;;  %v1444_v46 = vsel %vm5260_vm13, %v1432_v6, %v1434_v38  ;;  %v1440_v20 = vpop.permute.xlu1 %1439  ;;  %v5261_v51 = vld [vmem:[#allocation34_spill] sm:$0xff]  ;;  %v5269_v36 = vld [vmem:[#allocation40_spill] sm:$0xff] }
 0x14c   : > { %v4377_v35 = vadd.f32 %v5258_v58, %v1804_v53  ;;  %v1194_v57 = vrot.slane %v4247_v29, %v5253_v37  ;;  %v1605_v34 = vadd.f32 %v1539_v1, %v4240_v62  ;;  %v4390_v43 = vsel %vm5082_vm12, %v5261_v51, %v1445_v44  ;;  %v1438_v53 = vpop.permute.xlu0 %1437  ;;  %v5265_v37 = vld [vmem:[#allocation39_spill] sm:$0xff]  ;;  %vm5268_vm12 = vmmov %vm5239_vm5  ;;  %v5274_v58 = vld [vmem:[#allocation48_spill] sm:$0xff] }
 0x14d   : > { %v1448_v10 = vsel %vm5263_vm14, %v1440_v20, %v1426_v31  ;;  %v1198_v13 = vrot.slane %v4247_v29, %v5255_v12  ;;  %v5264_v6 = vrot.slane %v5211_v5, %v5188_v45  ;;  %v4404_v62 = vsel %vm5090_vm7, %v5265_v37, %v1443_v40  ;;  %vm5275_vm7 = vmmov %vm5239_vm5  ;;  %v5276_v12 = vld [vmem:[#allocation81_spill] sm:$0xff] }
 0x14e   : > { %5259 = vst [vmem:[#allocation18_spill] sm:$0xff] %v4377_v35  ;;  %v4409_v44 = vsel %vm3136_vm15, %v5194_v22, %v1448_v10  ;;  %v1441_v31 = vsel %vm5268_vm12, %v1438_v53, %v1440_v20  ;;  %v1468_v18 = vsel %vm5088_vm8, %v5269_v36, %v1444_v46  ;;  %v1225_v1 = vadd.f32 %v1194_v57, %v5274_v58 }
 0x14f   : > { %v4399_v38 = vadd.f32 %v5264_v6, %v1803_v33  ;;  %v4418_v45 = vadd.f32 %v4167_v41, %v4409_v44  ;;  %v5272_v33 = vld [vmem:[#allocation43_spill] sm:$0xff]  ;;  %v1442_v10 = vsel %vm5275_vm7, %v1436_v21, %v1438_v53  ;;  %v1380_v46 = vpop.permute.xlu1 %1379  ;;  %v1226_v52 = vadd.f32 %v1198_v13, %v5276_v12  ;;  %v5281_v12 = vld [vmem:[#allocation74_spill] sm:$0xff] }
 0x150   : > { %v4423_v40 = vsel %vm3142_vm1, %v5272_v33, %v1441_v31  ;;  %v1186_v41 = vrot.slane %v4247_v29, %v2632_v2  ;;  %v4436_v19 = vpop.permute.xlu0 %1377  ;;  %v5277_v31 = vld [vmem:[#allocation73_spill] sm:$0xff]  ;;  %v1190_v57 = vrot.slane %v4247_v29, %v5234_v28  ;;  %v5278_v21 = vcombine.low %v3881_v42, %v4179_v3  ;;  %v5284_v29 = vld [vmem:[#allocation44_spill] sm:$0xff] }
 0x151   : > { %5271 = vst [vmem:[#allocation19_spill] sm:$0xff] %v4418_v45  ;;  %v4431_v20 = vadd.f32 %v4263_v8, %v4423_v40  ;;  %v1274_v6 = vadd.f32 %v5277_v31, %v1225_v1  ;;  %v5279_v8 = vld [vmem:[#allocation77_spill] sm:$0xff]  ;;  %vm5280_vm1 = vcmp.lt.s32.totalorder %v2843_v30, 1  ;;  %v1275_v35 = vadd.f32 %v5281_v12, %v1226_v52 }
 0x152   : > { %v1095_v53 = vadd.f32 %v5278_v21, %v4234_v25  ;;  %v1154_v58 = vmul.f32 %v4220_v27, %v5279_v8  ;;  %v1399_v13 = vsel %vm5280_vm1, %v4436_v19, %v1380_v46  ;;  %v1223_v45 = vadd.f32 %v1186_v41, %v5282_v0  ;;  %v5287_v25 = vld [vmem:[#allocation116_spill] sm:$0xff]  ;;  %v5288_v0 = vld [vmem:[#allocation75_spill] sm:$0xff]  ;;  %vm5292_vm8 = vmmov %vm5280_vm1 }
 0x153   : > { %v4453_v1 = vrot.slane %v1321_v59, %v5097_v50  ;;  %v1470_v42 = vsel %vm3155_vm9, %v5284_v29, %v1442_v10  ;;  %v1418_v27 = vsel %vm2891_vm2, %v5246_v32, %v1399_v13  ;;  %v1224_v21 = vadd.f32 %v1190_v57, %v5287_v25  ;;  %v1384_v52 = vpop.permute.xlu1 %1383  ;;  %v5290_v13 = vld [vmem:[#allocation76_spill] sm:$0xff]  ;;  %vm5291_vm2 = vmmov %vm5280_vm1 }
 0x154   : > { %v1155_v8 = vadd.f32 %v1154_v58, %v1095_v53  ;;  %v1586_v26 = vsub.f32 %v1466_v56, %v1418_v27  ;;  %v1618_v54 = vadd.f32 %v1610_v39, %v1418_v27  ;;  %v1289_v14 = vcombine.low %v1274_v6, %v1275_v35  ;;  %v1382_v32 = vpop.permute.xlu0 %1381  ;;  %v5294_v6 = vld [vmem:[#allocation78_spill] sm:$0xff]  ;;  %v5295_v58 = vld [vmem:[#allocation53_spill] sm:$0xff] }
 0x155   : > { %5283 = vst [vmem:[#allocation100_spill] sm:$0xff] %v4453_v1  ;;  %v1272_v41 = vadd.f32 %v5288_v0, %v1223_v45  ;;  %v5289_v59 = vrot.slane %v5211_v5, %v5182_v9  ;;  %v1611_v10 = vadd.f32 %v4313_v24, %v4390_v43  ;;  %v1613_v28 = vadd.f32 %v1605_v34, %v4404_v62 }
 0x156   : > { %v1273_v57 = vadd.f32 %v5290_v13, %v1224_v21  ;;  %1339 = vst [vmem:[%s4474_s15] ss:$4 sm:$0xff] %v1155_v8  ;;  %v1612_v56 = vadd.f32 %v4317_v16, %v1468_v18  ;;  %v1594_v39 = vmul.f32 9600.0, %v1586_v26  ;;  %v4479_v9 = vrot.slane %v1289_v14, %v5097_v50  ;;  %v5297_v14 = vld [vmem:[#allocation60_spill] sm:$0xff] }
 0x157   : > { %v4466_v1 = vadd.f32 %v5289_v59, %v1802_v4  ;;  %v1397_v5 = vsel %vm5291_vm2, %v1382_v32, %v1384_v52  ;;  %v1614_v24 = vadd.f32 %v1606_v15, %v1470_v42  ;;  %v1398_v4 = vsel %vm5292_vm8, %v1380_v46, %v1382_v32  ;;  %v4498_v46 = vpop.permute.xlu1 %1387 }
 0x158   : > { %v1420_v34 = vsel %vm2877_vm0, %v5269_v36, %v1397_v5  ;;  %v1288_v45 = vcombine.low %v1272_v41, %v1273_v57  ;;  %v1654_v53 = vsub.f32 %v1618_v54, %v5294_v6  ;;  %v5296_v26 = vrot.slane %v5295_v58, %v2632_v2  ;;  %v1386_v54 = vpop.permute.xlu0 %1385  ;;  %vm5300_vm0 = vmmov %vm5280_vm1 }
 0x159   : > { %v5298_v3 = vrot.slane %v5297_v14, %v2632_v2  ;;  %v1419_v25 = vsel %vm2897_vm3, %v5261_v51, %v1398_v4  ;;  %v1588_v36 = vsub.f32 %v1468_v18, %v1420_v34  ;;  %v1620_v41 = vadd.f32 %v1612_v56, %v1420_v34  ;;  %vm5301_vm3 = vmmov %vm5300_vm0  ;;  %v5304_v56 = vld [vmem:[#allocation91_spill] sm:$0xff]  ;;  %v5306_v34 = vld [vmem:[#allocation26_spill] sm:$0xff] }
 0x15a   : > { %v1888_v16 = vmul.f32 %v5296_v26, %v1594_v39  ;;  %v1587_v21 = vsub.f32 %v4390_v43, %v1419_v25  ;;  %v1619_v8 = vadd.f32 %v1611_v10, %v1419_v25  ;;  %v1395_v57 = vsel %vm5300_vm0, %v1386_v54, %v4498_v46  ;;  %v5302_v43 = vld [vmem:[#allocation33_spill] sm:$0xff]  ;;  %vm5330_vm15 = vmmov %vm5300_vm0 }
 0x15b   : > { %v2089_v27 = vmul.f32 %v5298_v3, %v1594_v39  ;;  %v1396_v51 = vsel %vm5301_vm3, %v1384_v52, %v1386_v54  ;;  %v1596_v5 = vmul.f32 9600.0, %v1588_v36  ;;  %v5303_v18 = vrot.slane %v5302_v43, 1  ;;  %v5312_v25 = vld [vmem:[#allocation61_spill] sm:$0xff]  ;;  %v5314_v36 = vld [vmem:[#allocation64_spill] sm:$0xff]  ;;  %vm5334_vm6 = vmmov %vm5300_vm0 }
 0x15c   : > { %v4502_v59 = vadd.f32 %v1888_v16, %v4311_v17  ;;  %v1595_v39 = vmul.f32 9600.0, %v1587_v21  ;;  %v1656_v4 = vsub.f32 %v1620_v41, %v5304_v56  ;;  %v4515_v35 = vmul.f32 0.00192, %v1654_v53  ;;  %v5308_v16 = vld [vmem:[#allocation59_spill] sm:$0xff] }
 0x15d   : > { %v4505_v32 = vadd.f32 %v2089_v27, %v4215_v63  ;;  %v1655_v10 = vsub.f32 %v1619_v8, %v5303_v18  ;;  %v1421_v63 = vsel %vm2940_vm4, %v5265_v37, %v1396_v51  ;;  %vm5307_vm9 = vnez %v5306_v34  ;;  %v5310_v27 = vld [vmem:[#allocation62_spill] sm:$0xff]  ;;  %v5317_v34 = vld [vmem:[#allocation93_spill] sm:$0xff]  ;;  %vm5329_vm4 = vmmov %vm5300_vm0 }
 0x15e   : > { %v1422_v6 = vsel %vm5307_vm9, %v5284_v29, %v1395_v57  ;;  %v4524_v58 = vrot.slane %v1288_v45, %v5097_v50  ;;  %v1664_v26 = vmul.f32 0.00192, %v1656_v4  ;;  %v5309_v14 = vrot.slane %v5308_v16, %v2632_v2 }
 0x15f   : > { %v1663_v52 = vmul.f32 0.00192, %v1655_v10  ;;  %v5311_v53 = vrot.slane %v5310_v27, %v2632_v2  ;;  %v5313_v37 = vrot.slane %v5312_v25, %v2632_v2  ;;  %v5315_v29 = vrot.slane %v5314_v36, %v2632_v2  ;;  %v5320_v27 = vld [vmem:[#allocation63_spill] sm:$0xff]  ;;  %v1390_v36 = vpop.permute.xlu0 %1389 }
 0x160   : > { %v1889_v3 = vmul.f32 %v5309_v14, %v1595_v39  ;;  %v1589_v45 = vsub.f32 %v4404_v62, %v1421_v63  ;;  %v1590_v41 = vsub.f32 %v1470_v42, %v1422_v6  ;;  %v1621_v43 = vadd.f32 %v1613_v28, %v1421_v63  ;;  %v5318_v14 = vld [vmem:[#allocation36_spill] sm:$0xff]  ;;  %v5324_v63 = vld [vmem:[#allocation65_spill] sm:$0xff] }
 0x161   : > { %v1890_v15 = vmul.f32 %v5311_v53, %v1596_v5  ;;  %v2090_v21 = vmul.f32 %v5313_v37, %v1595_v39  ;;  %v2091_v8 = vmul.f32 %v5315_v29, %v1596_v5  ;;  %v1912_v51 = vcombine.low %v1663_v52, %v1664_v26  ;;  %v5316_v39 = vld [vmem:[#allocation97_spill] sm:$0xff]  ;;  %v5322_v52 = vld [vmem:[#allocation70_spill] sm:$0xff] }
 0x162   : > { %v1897_v54 = vadd.f32 %v1889_v3, %v4364_v11  ;;  %v1597_v56 = vmul.f32 9600.0, %v1589_v45  ;;  %v1598_v4 = vmul.f32 9600.0, %v1590_v41  ;;  %v1622_v5 = vadd.f32 %v1614_v24, %v1422_v6  ;;  %v5326_v3 = vld [vmem:[#allocation71_spill] sm:$0xff]  ;;  %v5328_v29 = vld [vmem:[#allocation102_spill] sm:$0xff] }
 0x163   : > { %v1898_v57 = vadd.f32 %v1890_v15, %v4369_v61  ;;  %v2098_v18 = vadd.f32 %v2090_v21, %v4283_v60  ;;  %v2099_v10 = vadd.f32 %v2091_v8, %v4261_v7  ;;  %v1920_v17 = vmul.f32 %v1912_v51, %v5316_v39  ;;  %v1392_v21 = vpop.permute.xlu1 %1391 }
 0x164   : > { %v2105_v16 = vmul.f32 %v1912_v51, %v5317_v34  ;;  %v5319_v62 = vrot.slane %v5318_v14, 1  ;;  %v5321_v11 = vrot.slane %v5320_v27, %v2632_v2  ;;  %v5323_v28 = vrot.slane %v5322_v52, %v2632_v2  ;;  %v5335_v14 = vld [vmem:[#allocation101_spill] sm:$0xff] }
 0x165   : > { %v5325_v7 = vrot.slane %v5324_v63, %v2632_v2  ;;  %v5327_v53 = vrot.slane %v5326_v3, %v2632_v2  ;;  %v1928_v24 = vcombine.high %v1920_v17, %v1920_v17  ;;  %v1937_v6 = vadd.f32 %v1920_v17, %v1897_v54 }
 0x166   : > { %v1657_v42 = vsub.f32 %v1621_v43, %v5319_v62  ;;  %v1891_v61 = vmul.f32 %v5321_v11, %v1597_v56  ;;  %v1892_v60 = vmul.f32 %v5323_v28, %v1598_v4  ;;  %v2113_v25 = vcombine.high %v2105_v16, %v2105_v16  ;;  %v5338_v11 = vld [vmem:[#allocation31_spill] sm:$0xff] }
 0x167   : > { %v2092_v26 = vmul.f32 %v5325_v7, %v1597_v56  ;;  %v2093_v15 = vmul.f32 %v5327_v53, %v1598_v4  ;;  %v2122_v37 = vadd.f32 %v2105_v16, %v2098_v18  ;;  %v1658_v8 = vsub.f32 %v1622_v5, %v5328_v29  ;;  %v5331_v16 = vld [vmem:[#allocation49_spill] sm:$0xff] }
 0x168   : > { %v1665_v45 = vmul.f32 0.00192, %v1657_v42  ;;  %v1899_v41 = vadd.f32 %v1891_v61, %v4466_v1  ;;  %v1900_v51 = vadd.f32 %v1892_v60, %v4399_v38  ;;  %v1938_v43 = vadd.f32 %v1928_v24, %v1898_v57  ;;  %v5336_v42 = vld [vmem:[#allocation30_spill] sm:$0xff]  ;;  %v5340_v61 = vld [vmem:[#allocation107_spill] sm:$0xff]  ;;  %v5342_v60 = vld [vmem:[#allocation72_spill] sm:$0xff] }
 0x169   : > { %v2123_v39 = vadd.f32 %v2113_v25, %v2099_v10  ;;  %v2130_v56 = vadd.f32 %v2122_v37, %v5277_v31  ;;  %v2100_v34 = vadd.f32 %v2092_v26, %v4357_v48  ;;  %v1666_v4 = vmul.f32 0.00192, %v1658_v8  ;;  %v5332_v10 = vld [vmem:[#allocation29_spill] sm:$0xff] }
 0x16a   : > { %v2101_v54 = vadd.f32 %v2093_v15, %v4342_v23  ;;  %v1400_v18 = vsel %vm5329_vm4, %v1392_v21, %v4436_v19  ;;  %v1393_v17 = vsel %vm5330_vm15, %v1390_v36, %v1392_v21  ;;  %v2153_v57 = vcombine.low %v1937_v6, %v1938_v43  ;;  %v5344_v6 = vld [vmem:[#allocation50_spill] sm:$0xff]  ;;  %v5346_v21 = vld [vmem:[#allocation51_spill] sm:$0xff] }
 0x16b   : > { %v2131_v1 = vadd.f32 %v2123_v39, %v5281_v12  ;;  %v2138_v38 = vsub.f32 %v5331_v16, %v2130_v56  ;;  %vm5333_vm5 = vnez %v5332_v10  ;;  %v1913_v48 = vcombine.low %v1665_v45, %v1666_v4  ;;  %v5349_v39 = vld [vmem:[#allocation95_spill] sm:$0xff] }
 0x16c   : > { %v1417_v31 = vsel %vm5333_vm5, %v5196_v47, %v1400_v18  ;;  %v1394_v19 = vsel %vm5334_vm6, %v4498_v46, %v1390_v36  ;;  %v2157_v12 = vrot.slane %v2153_v57, 7  ;;  %vm5337_vm10 = vnez %v5336_v42  ;;  %v5351_v18 = vld [vmem:[#allocation19_spill] sm:$0xff] }
 0x16d   : > { %v1585_v23 = vsub.f32 %v4334_v49, %v1417_v31  ;;  %v1617_v5 = vadd.f32 %v4346_v55, %v1417_v31  ;;  %v2139_v62 = vsub.f32 %v5335_v14, %v2131_v1  ;;  %v1423_v27 = vsel %vm5337_vm10, %v5272_v33, %v1394_v19  ;;  %v5341_v49 = vld [vmem:[#allocation103_spill] sm:$0xff]  ;;  %v5352_v1 = vld [vmem:[#allocation56_spill] sm:$0xff]  ;;  %v5354_v31 = vld [vmem:[#allocation22_spill] sm:$0xff] }
 0x16e   : > { %vm5339_vm11 = vnez %v5338_v11  ;;  %v1921_v52 = vmul.f32 %v1913_v48, %v5340_v61  ;;  %v2106_v28 = vmul.f32 %v1913_v48, %v5341_v49  ;;  %v5343_v63 = vrot.slane %v5342_v60, 1  ;;  %2165 = vst [vmem:[%s4474_s15 + $0x8] sm:$0xee] %v2157_v12  ;;  %v5358_v14 = vld [vmem:[#allocation110_spill] sm:$0xff] }
 0x16f   : > { %v1424_v47 = vsel %vm5339_vm11, %v5194_v22, %v1393_v17  ;;  %v1593_v55 = vmul.f32 9600.0, %v1585_v23  ;;  %v2177_v46 = vcombine.low %v2138_v38, %v2139_v62  ;;  %v1591_v7 = vsub.f32 %v4423_v40, %v1423_v27  ;;  %v5353_v38 = vld [vmem:[#allocation105_spill] sm:$0xff] }
 0x170   : > { %v1653_v30 = vsub.f32 %v1617_v5, %v5343_v63  ;;  %v1592_v26 = vsub.f32 %v4409_v44, %v1424_v47  ;;  %v1623_v3 = vadd.f32 %v4431_v20, %v1423_v27  ;;  %v1929_v33 = vcombine.high %v1921_v52, %v1921_v52  ;;  %v5348_v44 = vld [vmem:[#allocation55_spill] sm:$0xff]  ;;  %v5357_v5 = vld [vmem:[#allocation108_spill] sm:$0xff]  ;;  %v5361_v27 = vld [vmem:[#allocation106_spill] sm:$0xff] }
 0x171   : > { %v1939_v53 = vadd.f32 %v1921_v52, %v1899_v41  ;;  %v2114_v15 = vcombine.high %v2106_v28, %v2106_v28  ;;  %v2124_v22 = vadd.f32 %v2106_v28, %v2100_v34  ;;  %v5345_v25 = vrot.slane %v5344_v6, %v2632_v2  ;;  %v5350_v34 = vld [vmem:[#allocation82_spill] sm:$0xff] }
 0x172   : > { %v1661_v24 = vmul.f32 0.00192, %v1653_v30  ;;  %v5347_v36 = vrot.slane %v5346_v21, %v2632_v2  ;;  %v1599_v8 = vmul.f32 9600.0, %v1591_v7  ;;  %v1940_v40 = vadd.f32 %v1929_v33, %v1900_v51  ;;  %v5362_v52 = vld [vmem:[#allocation66_spill] sm:$0xff] }
 0x173   : > { %v1887_v37 = vmul.f32 %v5345_v25, %v1593_v55  ;;  %v2125_v45 = vadd.f32 %v2114_v15, %v2101_v54  ;;  %v2132_v43 = vadd.f32 %v2124_v22, %v5348_v44  ;;  %v1600_v20 = vmul.f32 9600.0, %v1592_v26  ;;  %v5356_v54 = vld [vmem:[#allocation109_spill] sm:$0xff] }
 0x174   : > { %v2088_v29 = vmul.f32 %v5347_v36, %v1593_v55  ;;  %v1911_v41 = vcombine.low %v1661_v24, %v4515_v35  ;;  %v1624_v17 = vadd.f32 %v5351_v18, %v1424_v47  ;;  %v2154_v10 = vcombine.low %v1939_v53, %v1940_v40  ;;  %v5359_v35 = vld [vmem:[#allocation68_spill] sm:$0xff]  ;;  %v5365_v53 = vld [vmem:[#allocation99_spill] sm:$0xff]  ;;  %v5366_v25 = vld [vmem:[#allocation69_spill] sm:$0xff] }
 0x175   : > { %v1895_v56 = vadd.f32 %v1887_v37, %v5349_v39  ;;  %v2133_v16 = vadd.f32 %v2125_v45, %v5352_v1  ;;  %v2140_v57 = vsub.f32 %v5353_v38, %v2132_v43  ;;  %v5355_v48 = vrot.slane %v5354_v31, 1  ;;  %v5374_v18 = vld [vmem:[#allocation84_spill] sm:$0xff] }
 0x176   : > { %v2096_v4 = vadd.f32 %v2088_v29, %v5350_v34  ;;  %v1919_v23 = vmul.f32 %v1911_v41, %v5356_v54  ;;  %v2104_v19 = vmul.f32 %v1911_v41, %v5357_v5  ;;  %v1660_v62 = vsub.f32 %v1624_v17, %v5358_v14  ;;  %v5368_v29 = vld [vmem:[#allocation67_spill] sm:$0xff]  ;;  %v5372_v41 = vld [vmem:[#allocation92_spill] sm:$0xff] }
 0x177   : > { %v1659_v51 = vsub.f32 %v1623_v3, %v5355_v48  ;;  %v5360_v12 = vrot.slane %v5359_v35, %v2632_v2  ;;  %v2141_v11 = vsub.f32 %v5361_v27, %v2133_v16  ;;  %v2158_v47 = vrot.slane %v2154_v10, 7  ;;  %v5364_v3 = vld [vmem:[#allocation18_spill] sm:$0xff]  ;;  %v5379_v54 = vld [vmem:[#allocation15_spill] sm:$0xff]  ;;  %v5382_v14 = vld [vmem:[#allocation100_spill] sm:$0xff] }
 0x178   : > { %v5363_v49 = vrot.slane %v5362_v52, %v2632_v2  ;;  %v1927_v55 = vcombine.high %v1919_v23, %v1919_v23  ;;  %v1935_v60 = vadd.f32 %v1919_v23, %v1895_v56  ;;  %v2112_v63 = vcombine.high %v2104_v19, %v2104_v19  ;;  %v5370_v56 = vld [vmem:[#allocation114_spill] sm:$0xff]  ;;  %v5386_v52 = vld [vmem:[#allocation104_spill] sm:$0xff] }
 0x179   : > { %v1893_v42 = vmul.f32 %v5360_v12, %v1599_v8  ;;  %v1667_v61 = vmul.f32 0.00192, %v1659_v51  ;;  %v2120_v30 = vadd.f32 %v2104_v19, %v2096_v4  ;;  %v2178_v7 = vcombine.low %v2140_v57, %v2141_v11  ;;  %2166 = vst [vmem:[%s4474_s15 + $0x10] sm:$0xee] %v2158_v47  ;;  %v5373_v4 = vld [vmem:[#allocation96_spill] sm:$0xff]  ;;  %v5378_v51 = vld [vmem:[#allocation79_spill] sm:$0xff] }
 0x17a   : > { %v1894_v28 = vmul.f32 %v5363_v49, %v1600_v20  ;;  %v1668_v26 = vmul.f32 0.00192, %v1660_v62  ;;  %v1936_v22 = vadd.f32 %v1927_v55, %v4502_v59  ;;  %v2121_v24 = vadd.f32 %v2112_v63, %v4505_v32  ;;  %v5383_v35 = vld [vmem:[#allocation14_spill] sm:$0xff]  ;;  %v5385_v47 = vld [vmem:[#allocation57_spill] sm:$0xff] }
 0x17b   : > { %v1901_v33 = vadd.f32 %v1893_v42, %v5364_v3  ;;  %v2128_v6 = vadd.f32 %v2120_v30, %v5288_v0  ;;  %v5367_v37 = vrot.slane %v5366_v25, %v2632_v2  ;;  %v5369_v40 = vrot.slane %v5368_v29, %v2632_v2  ;;  %v5375_v2 = vld [vmem:[#allocation113_spill] sm:$0xff]  ;;  %v5387_v55 = vld [vmem:[#allocation58_spill] sm:$0xff] }
 0x17c   : > { %v1902_v15 = vadd.f32 %v1894_v28, %v5365_v53  ;;  %v1914_v36 = vcombine.low %v1667_v61, %v1668_v26  ;;  %v1320_v44 = vcombine.low %v4524_v58, %v4479_v9  ;;  %v2181_v43 = vrot.slane %v2177_v46, 7  ;;  %v5377_v58 = vld [vmem:[#allocation112_spill] sm:$0xff] }
 0x17d   : > { %v2094_v21 = vmul.f32 %v5367_v37, %v1599_v8  ;;  %v2095_v45 = vmul.f32 %v5369_v40, %v1600_v20  ;;  %v2129_v59 = vadd.f32 %v2121_v24, %v5290_v13  ;;  %v2152_v39 = vcombine.low %v1935_v60, %v1936_v22  ;;  %v5376_v13 = vld [vmem:[#allocation111_spill] sm:$0xff] }
 0x17e   : > { %v5371_v32 = vcombine.high %v5370_v56, %v5370_v56  ;;  %v1922_v8 = vmul.f32 %v1914_v36, %v5373_v4  ;;  %v2107_v20 = vmul.f32 %v1914_v36, %v5375_v2  ;;  %v1328_v1 = vrot.slane %v1320_v44, %v5097_v50  ;;  %2189 = vst [vmem:[%s4645_s18 + $0x8] sm:$0xee] %v2181_v43 }
 0x17f   : > { %v2102_v34 = vadd.f32 %v2094_v21, %v5372_v41  ;;  %v2103_v17 = vadd.f32 %v2095_v45, %v5374_v18  ;;  %v2136_v9 = vsub.f32 %v5376_v13, %v2128_v6  ;;  %v2137_v46 = vsub.f32 %v5377_v58, %v2129_v59 }
 0x180   : > { %v1999_v0 = vrot.slane %v5371_v32, 1  ;;  %v2156_v16 = vrot.slane %v2152_v39, 7  ;;  %v2182_v38 = vrot.slane %v2178_v7, 7  ;;  %v1930_v57 = vcombine.high %v1922_v8, %v1922_v8 }
 0x181   : > { %v1941_v10 = vadd.f32 %v1922_v8, %v1901_v33  ;;  %v2115_v31 = vcombine.high %v2107_v20, %v2107_v20  ;;  %v2126_v48 = vadd.f32 %v2107_v20, %v2102_v34  ;;  %v2176_v50 = vcombine.low %v2136_v9, %v2137_v46 }
 0x182   : > { %v5380_v23 = vrot.slane %v5378_v51, %v5379_v54  ;;  %v5381_v5 = vrot.slane %v5370_v56, 1  ;;  %2164 = vst [vmem:[%s4474_s15] sm:$0xee] %v2156_v16  ;;  %v1336_v62 = vcombine.low %v1328_v1, %v5382_v14  ;;  %2190 = vst [vmem:[%s4645_s18 + $0x10] sm:$0xee] %v2182_v38  ;;  %v5384_v12 = vrot.slane %v5378_v51, %v5383_v35 }
 0x183   : > { %v1942_v27 = vadd.f32 %v1930_v57, %v1902_v15  ;;  %v2127_v11 = vadd.f32 %v2115_v31, %v2103_v17  ;;  %v2134_v61 = vadd.f32 %v2126_v48, %v5385_v47  ;;  %v2180_v28 = vrot.slane %v2176_v50, 7 }
 0x184   : > { %v2014_v19 = vmul.f32 %v5381_v5, %v5380_v23  ;;  %v2015_v42 = vmul.f32 %v1999_v0, %v5384_v12  ;;  %v1338_v49 = vsub.f32 %v5386_v52, %v1336_v62 }
 0x185   : > { %v2135_v60 = vadd.f32 %v2127_v11, %v5387_v55  ;;  %v2155_v63 = vcombine.low %v1941_v10, %v1942_v27  ;;  %2188 = vst [vmem:[%s4645_s18] sm:$0xee] %v2180_v28 }
 0x186   : > { %1340 = vst [vmem:[%s4645_s18] ss:$4 sm:$0xff] %v1338_v49  ;;  %v2142_v30 = vsub.f32 %v2014_v19, %v2134_v61 }
 0x187   : > { %v2143_v7 = vsub.f32 %v2015_v42, %v2135_v60  ;;  %v2159_v26 = vrot.slane %v2155_v63, 7 }
 0x189   : > { %v2179_v3 = vcombine.low %v2142_v30, %v2143_v7  ;;  %2167 = vst [vmem:[%s4474_s15 + $0x18] sm:$0xee] %v2159_v26 }
 0x18a   : > { %2447 = shalt.err (!%p2444_p3)
}
 0x18b   : > { %s2448_s12 = scalar_lea.hbm %s4673_s7, 512  ;;  %s2452_s15 = scalar_lea.hbm %s4756_s4, 1024 }
 0x18c   : > { %p2449_p4 = scmp.ne.s32.totalorder %s4673_s7, %s2448_s12  ;;  %p2453_p9 = scmp.lt.u32.totalorder %s4673_s7, %s4756_s4 }
 0x18d   : > { %p2454_p10 = scmp.lt.u32.totalorder %s2452_s15, %s2448_s12  ;;  %p2456_p12 = scmp.lt.u32.totalorder %s2448_s12, %s4673_s7 }
 0x18e   : > { %p2450_p7 = pnand %p2449_p4, %p2608_p5 }
 0x18f   : > { %p2455_p11 = por %p2454_p10, %p2453_p9 }
 0x190   : > { %p2451_p8 = pneg %p2450_p7 }
 0x191   : > { %p2457_p13 = por %p2456_p12, %p2455_p11 }
 0x193   : > { %p2458_p0 = pnand %p2457_p13, %p2451_p8 }
 0x195   : > { %2461 = shalt.err (!%p2458_p0)
}
 0x196   : > { %2379 = dma.vmem_to_hbm [thread:$0]  (%p2608_p5), %s4675_s24, 512, %s4673_s7, %s2193_s9   ;;  %v2183_v33 = vrot.slane %v2179_v3, 7 }
 0x197   : > { %s4706_s17 = scalar_lea.hbm %s4757_s5, %s2377_s19  ;;  %s2198_s10 = scalar_lea.sflag [#allocation6], %s4384_s6 }
 0x198   : > { %2191 = vst [vmem:[%s4645_s18 + $0x18] sm:$0xee] %v2183_v33  ;;  %s2462_s12 = scalar_lea.vmem %s4710_s8, 512  ;;  %s2536_s24 = smov [#allocation5]  }
 0x199   : > { %p2463_p1 = scmp.ne.s32.totalorder %s4710_s8, %s2462_s12  ;;  %s2466_s0 = sshll.u32 %s2536_s24, 4  ;;  %s2467_s0 = int_to_ptr.vmem [resolvable:$false] %s2466_s0 }
 0x19a   : > { %s2468_s7 = scalar_lea.vmem %s2467_s0, 1024  ;;  %p2469_p4 = scmp.lt.s32.totalorder %s4710_s8, %s2467_s0 }
 0x19b   : > { %p2464_p2 = pnand %p2463_p1, %p2608_p5  ;;  %p2470_p7 = scmp.lt.s32.totalorder %s2468_s7, %s2462_s12 }
 0x19d   : > { %p2465_p3 = pneg %p2464_p2  ;;  %p2471_p8 = por %p2470_p7, %p2469_p4 }
 0x19f   : > { %p2472_p9 = pnand %p2471_p8, %p2465_p3 }
 0x1a1   : > { %2475 = shalt.err (!%p2472_p9)
}
 0x1a2   : > { %s2476_s6 = scalar_lea.hbm %s4706_s17, 512  ;;  %s2480_s9 = scalar_lea.hbm %s4757_s5, 1024 }
 0x1a3   : > { %p2477_p10 = scmp.ne.s32.totalorder %s4706_s17, %s2476_s6  ;;  %p2481_p13 = scmp.lt.u32.totalorder %s4706_s17, %s4757_s5 }
 0x1a4   : > { %p2482_p0 = scmp.lt.u32.totalorder %s2480_s9, %s2476_s6  ;;  %p2484_p2 = scmp.lt.u32.totalorder %s2476_s6, %s4706_s17 }
 0x1a5   : > { %p2478_p11 = pnand %p2477_p10, %p2608_p5 }
 0x1a6   : > { %p2483_p1 = por %p2482_p0, %p2481_p13 }
 0x1a7   : > { %p2479_p12 = pneg %p2478_p11 }
 0x1a8   : > { %p2485_p3 = por %p2484_p2, %p2483_p1 }
 0x1aa   : > { %p2486_p4 = pnand %p2485_p3, %p2479_p12 }
 0x1ac   : > { %2489 = shalt.err (!%p2486_p4)
}
 0x1ad   : > { %2380 = dma.vmem_to_hbm [thread:$0]  (%p2608_p5), %s4710_s8, 512, %s4706_s17, %s2198_s10  }
 0x1ae PF: > { %p2390_p7 = scmp.ge.s32.totalorder %s2528_s23, 2  ;;  %s2238_s15 = sand.u32 1, %s2516_s20  }
 0x1af   : > { %s2239_s26 = scalar_lea.sflag [#allocation4], %s2238_s15 }
 0x1b0   : > { %p2384_p8 = pnand %p2390_p7, %p2612_p6 }
 0x1b2   : > { %2507 = dma.done.wait (!%p2384_p8), %s2239_s26, 512  }
 0x1b3   : > { %2509 = vsyncadd (!%p2384_p8), %s2239_s26, 4294966784  ;;  %s2248_s27 = scalar_lea.sflag [#allocation6], %s2238_s15 }
 0x1b4   : > { %2511 = dma.done.wait (!%p2384_p8), %s2248_s27, 512  }
 0x1b5   : > { %2513 = vsyncadd (!%p2384_p8), %s2248_s27, 4294966784  ;;  %p20_p5 = scmp.ge.s32.totalorder %s2595_s25, 4   ;;  %s5388_s20 = smov %s2520_s21 }
 0x1b6   : > { %s5389_s21 = smov %s2524_s22  ;;  %s5390_s22 = smov %s2606_s28 }
 0x1b7   : > { %s5391_s23 = smov %s2595_s25  ;;  %22 = sbr.rel (!%p20_p5) target bundleno = 7 (0x7), region = 98 }
 0x1be   :  { %2253 = vsyncpa [#allocation4], 1 }
 0x1bf   :  { %2255 = vsyncpa [#allocation4 + $0x1], 1 }
 0x1c0   :  { %2256 = vsyncpa [#allocation6], 1 }
 0x1c1   :  { %2258 = vsyncpa [#allocation6 + $0x1], 1 }

</bundles_post_ra>
